<compile_context>
chip_gen: v7x
topology: tpu7x:2x2x1
jax: 0.10.0
libtpu: 0.0.40
codegen_flags: <defaults>
</compile_context>

<pallas_src>
import math

import jax
import jax.numpy as jnp
from jax import lax
from jax.experimental import pallas as pl
from jax.experimental.pallas import tpu as pltpu

# ---------------- model configuration (small synthetic ViT) ----------------
IMG = 32            # preprocess resize target ("input_img_size")
PATCH = 8           # patch size
IN_CHANS = 3        # MVP asserts input_shape[0] == 3
EMBED_DIM = 32      # synthetic stand-in for 768 (ViT-B)
DEPTH = 2           # number of transformer blocks
NUM_HEADS = 4
HEAD_DIM = EMBED_DIM // NUM_HEADS
MLP_DIM = 4 * EMBED_DIM
NUM_PATCHES = (IMG // PATCH) ** 2      # 16
NUM_TOKENS = NUM_PATCHES + 1           # 17 (CLS + patches)
N_PAD = 32                             # tokens padded to a bf16-friendly tile
PATCH_DIM = IN_CHANS * PATCH * PATCH   # 192
LN_EPS = 1e-6
NEG_INF = -1e30

# In-kernel token layout per image block of N_PAD rows:
#   rows 0..15  : patch tokens        (sublane aligned -> aligned stores)
#   row  16     : CLS token
#   rows 17..31 : zero padding (masked as keys, never read as output)


# ------------------------------ kernel --------------------------------------
def _layernorm(x, gamma, beta):
    # f32 elementwise path (no bf16 here, keeps v5e VPU happy)
    mu = jnp.mean(x, axis=-1, keepdims=True)
    var = jnp.mean((x - mu) ** 2, axis=-1, keepdims=True)
    return (x - mu) * lax.rsqrt(var + LN_EPS) * gamma + beta


def _mvp_fused_kernel(patches_ref, pw_ref, pb_ref, cls_ref, pos_ref,
                      ln1g_ref, ln1b_ref, wqkv_ref, bqkv_ref, wp_ref, bp_ref,
                      ln2g_ref, ln2b_ref, w1_ref, b1_ref, w2_ref, b2_ref,
                      lnfg_ref, lnfb_ref, o_ref, tok_ref):
    d = EMBED_DIM
    layer = pl.program_id(1)

    # ---- layer 0: patch embed + aligned token assembly (one full store) ----
    @pl.when(layer == 0)
    def _():
        # (16, 192) x (192, 32) MXU matmul, bf16 operands / f32 accumulation
        emb = jnp.dot(patches_ref[...].astype(jnp.bfloat16), pw_ref[...],
                      preferred_element_type=jnp.float32) + pb_ref[...]
        # cls_ref is pre-padded to 16 rows (CLS at row 0, zeros below);
        # pos_ref is pre-permuted/padded to the in-kernel layout.
        toks = jnp.concatenate([emb, cls_ref[...]], axis=0) + pos_ref[...]
        tok_ref[...] = toks                       # single aligned (32,32) store

    # ---- hoisted additive key mask (full (N_PAD, N_PAD), built once) -------
    key_ids = lax.broadcasted_iota(jnp.int32, (N_PAD, N_PAD), 1)
    key_mask = jnp.where(key_ids < NUM_TOKENS, 0.0, NEG_INF).astype(jnp.float32)

    scale = 1.0 / math.sqrt(HEAD_DIM)

    # ---- one transformer block (weights for this layer streamed by grid) ---
    x = tok_ref[...]                              # (N_PAD, D) f32, VMEM-resident
    wqkv = wqkv_ref[0]                            # (D, 3D)  bf16
    wp = wp_ref[0]                                # (D, D)   bf16

    # LN1 + fused QKV projection
    xn = _layernorm(x, ln1g_ref[0], ln1b_ref[0])
    qkv = jnp.dot(xn.astype(jnp.bfloat16), wqkv,
                  preferred_element_type=jnp.float32) + bqkv_ref[0]
    q_all = qkv[:, 0:d] * scale
    k_all = qkv[:, d:2 * d]
    v_all = qkv[:, 2 * d:3 * d]

    # Attention: per-head scores + folded (v_h @ Wp_h); then ONE fused dot
    # p_cat (N_PAD, H*N_PAD) @ vw_stack (H*N_PAD, D) replaces the head-concat
    # and output projection (no head-dim-8 outputs, no per-head proj dots).
    p_heads = []
    vw_heads = []
    for h in range(NUM_HEADS):
        c0 = h * HEAD_DIM
        q_h = q_all[:, c0:c0 + HEAD_DIM].astype(jnp.bfloat16)
        k_h = k_all[:, c0:c0 + HEAD_DIM].astype(jnp.bfloat16)
        s = lax.dot_general(q_h, k_h, (((1,), (1,)), ((), ())),
                            preferred_element_type=jnp.float32)
        s = s + key_mask
        s = s - jnp.max(s, axis=-1, keepdims=True)
        p = jnp.exp(s)
        p = p * pl.reciprocal(jnp.sum(p, axis=-1, keepdims=True), approx=True)
        p_heads.append(p.astype(jnp.bfloat16))
        vw = jnp.dot(v_all[:, c0:c0 + HEAD_DIM].astype(jnp.bfloat16),
                     wp[c0:c0 + HEAD_DIM, :],
                     preferred_element_type=jnp.float32)
        vw_heads.append(vw.astype(jnp.bfloat16))
    p_cat = jnp.concatenate(p_heads, axis=1)      # (N_PAD, H*N_PAD) = (32, 128)
    vw_stack = jnp.concatenate(vw_heads, axis=0)  # (H*N_PAD, D)     = (128, 32)
    attn = jnp.dot(p_cat, vw_stack,
                   preferred_element_type=jnp.float32) + bp_ref[0]
    x = x + attn

    # LN2 + MLP
    xn2 = _layernorm(x, ln2g_ref[0], ln2b_ref[0])
    h1 = jnp.dot(xn2.astype(jnp.bfloat16), w1_ref[0],
                 preferred_element_type=jnp.float32) + b1_ref[0]
    # TODO(synk): PyTorch ViT uses exact erf GELU; tanh approximation used here.
    h1 = jax.nn.gelu(h1, approximate=True)
    mlp = jnp.dot(h1.astype(jnp.bfloat16), w2_ref[0],
                  preferred_element_type=jnp.float32) + b2_ref[0]
    tok_ref[...] = x + mlp

    # ---- last layer: final LayerNorm on the CLS row only, single store -----
    @pl.when(layer == pl.num_programs(1) - 1)
    def _():
        cls_row = tok_ref[NUM_PATCHES:NUM_PATCHES + 1, :]   # aligned row 16
        o_ref[0] = _layernorm(cls_row, lnfg_ref[...], lnfb_ref[...])


# ------------------------------ wrapper -------------------------------------
def mvp_encode(params, patches_flat, batch):
    args = (patches_flat, params['patch_w'], params['patch_b'],
            params['cls_pad'], params['pos_pad'],
            params['ln1_g'], params['ln1_b'], params['wqkv'], params['bqkv'],
            params['wproj'], params['bproj'], params['ln2_g'], params['ln2_b'],
            params['w1'], params['b1'], params['w2'], params['b2'],
            params['ln_f_g'], params['ln_f_b'])

    def const_spec(a):
        nd = a.ndim
        return pl.BlockSpec(a.shape, lambda b, l, _nd=nd: (0,) * _nd)

    def layer_spec(a):
        # stacked per-layer weights: block (1, ...), streamed per grid step
        return pl.BlockSpec((1,) + a.shape[1:], lambda b, l: (l, 0, 0))

    in_specs = [
        pl.BlockSpec((NUM_PATCHES, PATCH_DIM), lambda b, l: (b, 0)),  # patches
        const_spec(params['patch_w']),
        const_spec(params['patch_b']),
        const_spec(params['cls_pad']),
        const_spec(params['pos_pad']),
        layer_spec(params['ln1_g']),
        layer_spec(params['ln1_b']),
        layer_spec(params['wqkv']),
        layer_spec(params['bqkv']),
        layer_spec(params['wproj']),
        layer_spec(params['bproj']),
        layer_spec(params['ln2_g']),
        layer_spec(params['ln2_b']),
        layer_spec(params['w1']),
        layer_spec(params['b1']),
        layer_spec(params['w2']),
        layer_spec(params['b2']),
        const_spec(params['ln_f_g']),
        const_spec(params['ln_f_b']),
    ]

    out = pl.pallas_call(
        _mvp_fused_kernel,
        out_shape=jax.ShapeDtypeStruct((batch, 1, EMBED_DIM), jnp.float32),
        grid=(batch, DEPTH),
        in_specs=in_specs,
        out_specs=pl.BlockSpec((1, 1, EMBED_DIM), lambda b, l: (b, 0, 0)),
        scratch_shapes=[pltpu.VMEM((N_PAD, EMBED_DIM), jnp.float32)],
        compiler_params=pltpu.CompilerParams(
            dimension_semantics=("parallel", "arbitrary")),
    )(*args)
    return out.reshape(batch, EMBED_DIM)


def mvp_output_shape(input_shape):
    """Mirror of MVP.output_shape (synthetic embedding dim)."""
    assert len(input_shape) == 3
    return [EMBED_DIM]


def mvp_forward(params, x_nchw):
    """MVP.forward: resize preprocess -> fused ViT encoder -> CLS feature."""
    b, c, _, _ = x_nchw.shape
    assert c == IN_CHANS
    # preprocess = nn.Sequential(transforms.Resize(input_img_size))  (JAX glue)
    # TODO(synk): torchvision Resize uses antialiased bilinear; jax.image.resize differs slightly.
    x = jax.image.resize(x_nchw, (b, c, IMG, IMG), method='bilinear')

    # patch extraction in (C, ph, pw) order == Conv2d(k=patch, stride=patch) im2col
    hp = IMG // PATCH
    patches = x.reshape(b, c, hp, PATCH, hp, PATCH)
    patches = patches.transpose(0, 2, 4, 1, 3, 5).reshape(b * NUM_PATCHES,
                                                          PATCH_DIM)
    patches = patches.astype(jnp.bfloat16)          # MXU operand dtype

    out = mvp_encode(params, patches, b)

    # Backbone.forward output-shape check
    expected = mvp_output_shape(list(x_nchw.shape)[1:])
    if list(out.shape)[1:] != expected:
        raise ValueError(f'Size mismatch: expect size {expected}, '
                         f'but got size {list(out.shape)[1:]}')
    return out


# ------------------------------ param init ----------------------------------
def init_params(key):
    ks = jax.random.split(key, 7)
    g32 = lambda k, shape: (0.02 * jax.random.normal(k, shape)).astype(jnp.float32)
    gbf = lambda k, shape: (0.02 * jax.random.normal(k, shape)).astype(jnp.bfloat16)
    zeros = lambda shape: jnp.zeros(shape, jnp.float32)
    ones = lambda shape: jnp.ones(shape, jnp.float32)

    cls_tok = g32(ks[1], (1, EMBED_DIM))
    pos = g32(ks[2], (NUM_TOKENS, EMBED_DIM))       # row 0: CLS, rows 1..16: patches

    # In-kernel layout: patches at rows 0..15, CLS at row 16, zero pad 17..31.
    cls_pad = zeros((N_PAD - NUM_PATCHES, EMBED_DIM)).at[0].set(cls_tok[0])
    pos_pad = zeros((N_PAD, EMBED_DIM))
    pos_pad = pos_pad.at[:NUM_PATCHES].set(pos[1:NUM_TOKENS])   # patch positions
    pos_pad = pos_pad.at[NUM_PATCHES].set(pos[0])               # CLS position

    return {
        # patch embedding (matmul weights kept bf16, biases/LN params f32)
        'patch_w': gbf(ks[0], (PATCH_DIM, EMBED_DIM)),
        'patch_b': zeros((1, EMBED_DIM)),
        'cls_pad': cls_pad,                         # (16, D), CLS in row 0
        'pos_pad': pos_pad,                         # (N_PAD, D), permuted layout
        # transformer blocks, stacked with leading DEPTH axis (streamed per layer)
        'ln1_g': ones((DEPTH, 1, EMBED_DIM)),
        'ln1_b': zeros((DEPTH, 1, EMBED_DIM)),
        'wqkv': gbf(ks[3], (DEPTH, EMBED_DIM, 3 * EMBED_DIM)),
        'bqkv': zeros((DEPTH, 1, 3 * EMBED_DIM)),
        'wproj': gbf(ks[4], (DEPTH, EMBED_DIM, EMBED_DIM)),
        'bproj': zeros((DEPTH, 1, EMBED_DIM)),
        'ln2_g': ones((DEPTH, 1, EMBED_DIM)),
        'ln2_b': zeros((DEPTH, 1, EMBED_DIM)),
        'w1': gbf(ks[5], (DEPTH, EMBED_DIM, MLP_DIM)),
        'b1': zeros((DEPTH, 1, MLP_DIM)),
        'w2': gbf(ks[6], (DEPTH, MLP_DIM, EMBED_DIM)),
        'b2': zeros((DEPTH, 1, EMBED_DIM)),
        # final LayerNorm
        'ln_f_g': ones((1, EMBED_DIM)),
        'ln_f_b': zeros((1, EMBED_DIM)),
    }


# ---------------------------------- main -------------------------------------
if __name__ == "__main__":
    key = jax.random.PRNGKey(0)
    k_param, k_x = jax.random.split(key)
    params = init_params(k_param)

    # small NCHW input; preprocess resizes it to IMG x IMG (channels must be 3)
    x = jax.random.normal(k_x, (2, IN_CHANS, 16, 16), jnp.float32)

    out = jax.block_until_ready(mvp_forward(params, x))
    assert out.shape == (2, EMBED_DIM)
    assert bool(jnp.all(jnp.isfinite(out)))
    print("KERNEL_OK")
</pallas_src>

<mosaic_0001>
module attributes {stable_mosaic.version = 11 : i64} {
  func.func @_mvp_fused_kernel(%arg0: i32, %arg1: i32, %arg2: memref<16x192xbf16, #tpu.memory_space<vmem>>, %arg3: memref<192x32xbf16, #tpu.memory_space<vmem>>, %arg4: memref<1x32xf32, #tpu.memory_space<vmem>>, %arg5: memref<16x32xf32, #tpu.memory_space<vmem>>, %arg6: memref<32x32xf32, #tpu.memory_space<vmem>>, %arg7: memref<1x1x32xf32, #tpu.memory_space<vmem>>, %arg8: memref<1x1x32xf32, #tpu.memory_space<vmem>>, %arg9: memref<1x32x96xbf16, #tpu.memory_space<vmem>>, %arg10: memref<1x1x96xf32, #tpu.memory_space<vmem>>, %arg11: memref<1x32x32xbf16, #tpu.memory_space<vmem>>, %arg12: memref<1x1x32xf32, #tpu.memory_space<vmem>>, %arg13: memref<1x1x32xf32, #tpu.memory_space<vmem>>, %arg14: memref<1x1x32xf32, #tpu.memory_space<vmem>>, %arg15: memref<1x32x128xbf16, #tpu.memory_space<vmem>>, %arg16: memref<1x1x128xf32, #tpu.memory_space<vmem>>, %arg17: memref<1x128x32xbf16, #tpu.memory_space<vmem>>, %arg18: memref<1x1x32xf32, #tpu.memory_space<vmem>>, %arg19: memref<1x32xf32, #tpu.memory_space<vmem>>, %arg20: memref<1x32xf32, #tpu.memory_space<vmem>>, %arg21: memref<1x1x32xf32, #tpu.memory_space<vmem>>, %arg22: memref<32x32xf32, #tpu.memory_space<vmem>>) attributes {dimension_semantics = [#tpu.dimension_semantics<parallel>, #tpu.dimension_semantics<arbitrary>], iteration_bounds = array<i64: 2, 2>, scalar_prefetch = 0 : i64, scratch_operands = 1 : i64, tpu.core_type = #tpu.core_type<tc>, window_params = [{transform_indices = @transform_0, window_bounds = array<i64: 16, 192>}, {pipeline_mode = #tpu.pipeline_mode<synchronous>, transform_indices = @transform_1, window_bounds = array<i64: 192, 32>}, {pipeline_mode = #tpu.pipeline_mode<synchronous>, transform_indices = @transform_2, window_bounds = array<i64: 1, 32>}, {pipeline_mode = #tpu.pipeline_mode<synchronous>, transform_indices = @transform_3, window_bounds = array<i64: 16, 32>}, {pipeline_mode = #tpu.pipeline_mode<synchronous>, transform_indices = @transform_4, window_bounds = array<i64: 32, 32>}, {transform_indices = @transform_5, window_bounds = array<i64: 1, 1, 32>}, {transform_indices = @transform_6, window_bounds = array<i64: 1, 1, 32>}, {transform_indices = @transform_7, window_bounds = array<i64: 1, 32, 96>}, {transform_indices = @transform_8, window_bounds = array<i64: 1, 1, 96>}, {transform_indices = @transform_9, window_bounds = array<i64: 1, 32, 32>}, {transform_indices = @transform_10, window_bounds = array<i64: 1, 1, 32>}, {transform_indices = @transform_11, window_bounds = array<i64: 1, 1, 32>}, {transform_indices = @transform_12, window_bounds = array<i64: 1, 1, 32>}, {transform_indices = @transform_13, window_bounds = array<i64: 1, 32, 128>}, {transform_indices = @transform_14, window_bounds = array<i64: 1, 1, 128>}, {transform_indices = @transform_15, window_bounds = array<i64: 1, 128, 32>}, {transform_indices = @transform_16, window_bounds = array<i64: 1, 1, 32>}, {pipeline_mode = #tpu.pipeline_mode<synchronous>, transform_indices = @transform_17, window_bounds = array<i64: 1, 32>}, {pipeline_mode = #tpu.pipeline_mode<synchronous>, transform_indices = @transform_18, window_bounds = array<i64: 1, 32>}, {transform_indices = @transform_19, window_bounds = array<i64: 1, 1, 32>}]} {
    %c0_i32 = arith.constant 0 : i32
    %0 = arith.cmpi eq, %arg1, %c0_i32 : i32
    %1 = arith.extui %0 : i1 to i32
    %c0_i32_0 = arith.constant 0 : i32
    %2 = arith.cmpi ne, %1, %c0_i32_0 : i32
    scf.if %2 {
      %c0_77 = arith.constant 0 : index
      %c0_78 = arith.constant 0 : index
      %207 = vector.load %arg2[%c0_77, %c0_78] : memref<16x192xbf16, #tpu.memory_space<vmem>>, vector<16x192xbf16>
      %c0_79 = arith.constant 0 : index
      %c0_80 = arith.constant 0 : index
      %208 = vector.load %arg3[%c0_79, %c0_80] : memref<192x32xbf16, #tpu.memory_space<vmem>>, vector<192x32xbf16>
      %cst_81 = arith.constant dense<0.000000e+00> : vector<16x32xf32>
      %209 = tpu.matmul %207, %208, %cst_81 {dimension_numbers = #tpu.dot_dimension_numbers<[1], [0], [0], [1], [0, 0, 1, 1], [], []>} : vector<16x192xbf16>, vector<192x32xbf16>, vector<16x32xf32> -> vector<16x32xf32>
      %c0_82 = arith.constant 0 : index
      %c0_83 = arith.constant 0 : index
      %210 = vector.load %arg4[%c0_82, %c0_83] : memref<1x32xf32, #tpu.memory_space<vmem>>, vector<1x32xf32>
      %211 = vector.broadcast %210 : vector<1x32xf32> to vector<16x32xf32>
      %212 = arith.addf %209, %211 : vector<16x32xf32>
      %c0_84 = arith.constant 0 : index
      %c0_85 = arith.constant 0 : index
      %213 = vector.load %arg5[%c0_84, %c0_85] : memref<16x32xf32, #tpu.memory_space<vmem>>, vector<16x32xf32>
      %214 = tpu.concatenate %212, %213 in 0 : vector<16x32xf32>, vector<16x32xf32> -> vector<32x32xf32>
      %c0_86 = arith.constant 0 : index
      %c0_87 = arith.constant 0 : index
      %215 = vector.load %arg6[%c0_86, %c0_87] : memref<32x32xf32, #tpu.memory_space<vmem>>, vector<32x32xf32>
      %216 = arith.addf %214, %215 : vector<32x32xf32>
      %c0_88 = arith.constant 0 : index
      %c0_89 = arith.constant 0 : index
      %217 = vector.load %arg22[%c0_88, %c0_89] : memref<32x32xf32, #tpu.memory_space<vmem>>, vector<32x32xf32>
      tpu.vector_store %arg22[%c0_88, %c0_89], %216 {strides = array<i32>} : memref<32x32xf32, #tpu.memory_space<vmem>>, vector<32x32xf32>,
    } else {
    }
    %3 = tpu.iota {dimensions = array<i32: 1>} : vector<32x32xi32>
    %c17_i32 = arith.constant 17 : i32
    %4 = vector.broadcast %c17_i32 : i32 to vector<32x32xi32>
    %5 = arith.cmpi slt, %3, %4 : vector<32x32xi32>
    %cst = arith.constant 0.000000e+00 : f32
    %cst_1 = arith.constant -1.000000e+30 : f32
    %6 = vector.broadcast %cst : f32 to vector<32x32xf32>
    %7 = vector.broadcast %cst_1 : f32 to vector<32x32xf32>
    %8 = arith.select %5, %6, %7 : vector<32x32xi1>, vector<32x32xf32>
    %c0 = arith.constant 0 : index
    %c0_2 = arith.constant 0 : index
    %9 = vector.load %arg22[%c0, %c0_2] : memref<32x32xf32, #tpu.memory_space<vmem>>, vector<32x32xf32>
    %c0_3 = arith.constant 0 : index
    %c0_4 = arith.constant 0 : index
    %c0_5 = arith.constant 0 : index
    %10 = vector.load %arg9[%c0_3, %c0_4, %c0_5] : memref<1x32x96xbf16, #tpu.memory_space<vmem>>, vector<1x32x96xbf16>
    %11 = vector.shape_cast %10 : vector<1x32x96xbf16> to vector<32x96xbf16>
    %c0_6 = arith.constant 0 : index
    %c0_7 = arith.constant 0 : index
    %c0_8 = arith.constant 0 : index
    %12 = vector.load %arg11[%c0_6, %c0_7, %c0_8] : memref<1x32x32xbf16, #tpu.memory_space<vmem>>, vector<1x32x32xbf16>
    %13 = vector.shape_cast %12 : vector<1x32x32xbf16> to vector<32x32xbf16>
    %c0_9 = arith.constant 0 : index
    %c0_10 = arith.constant 0 : index
    %c0_11 = arith.constant 0 : index
    %14 = vector.load %arg7[%c0_9, %c0_10, %c0_11] : memref<1x1x32xf32, #tpu.memory_space<vmem>>, vector<1x1x32xf32>
    %15 = vector.shape_cast %14 : vector<1x1x32xf32> to vector<1x32xf32>
    %c0_12 = arith.constant 0 : index
    %c0_13 = arith.constant 0 : index
    %c0_14 = arith.constant 0 : index
    %16 = vector.load %arg8[%c0_12, %c0_13, %c0_14] : memref<1x1x32xf32, #tpu.memory_space<vmem>>, vector<1x1x32xf32>
    %17 = vector.shape_cast %16 : vector<1x1x32xf32> to vector<1x32xf32>
    %cst_15 = arith.constant dense<0.000000e+00> : vector<32xf32>
    %18 = vector.multi_reduction <add>, %9, %cst_15 [1] : vector<32x32xf32> to vector<32xf32>
    %19 = vector.shape_cast %18 : vector<32xf32> to vector<32x1xf32>
    %cst_16 = arith.constant 3.200000e+01 : f32
    %20 = vector.broadcast %cst_16 : f32 to vector<32x1xf32>
    %21 = arith.divf %19, %20 : vector<32x1xf32>
    %22 = vector.broadcast %21 : vector<32x1xf32> to vector<32x32xf32>
    %23 = arith.subf %9, %22 : vector<32x32xf32>
    %24 = arith.mulf %23, %23 : vector<32x32xf32>
    %cst_17 = arith.constant dense<0.000000e+00> : vector<32xf32>
    %25 = vector.multi_reduction <add>, %24, %cst_17 [1] : vector<32x32xf32> to vector<32xf32>
    %26 = vector.shape_cast %25 : vector<32xf32> to vector<32x1xf32>
    %cst_18 = arith.constant 3.200000e+01 : f32
    %27 = vector.broadcast %cst_18 : f32 to vector<32x1xf32>
    %28 = arith.divf %26, %27 : vector<32x1xf32>
    %29 = vector.broadcast %21 : vector<32x1xf32> to vector<32x32xf32>
    %30 = arith.subf %9, %29 : vector<32x32xf32>
    %cst_19 = arith.constant 9.99999997E-7 : f32
    %31 = vector.broadcast %cst_19 : f32 to vector<32x1xf32>
    %32 = arith.addf %28, %31 : vector<32x1xf32>
    %33 = math.rsqrt %32 : vector<32x1xf32>
    %34 = vector.broadcast %33 : vector<32x1xf32> to vector<32x32xf32>
    %35 = arith.mulf %30, %34 : vector<32x32xf32>
    %36 = vector.broadcast %15 : vector<1x32xf32> to vector<32x32xf32>
    %37 = arith.mulf %35, %36 : vector<32x32xf32>
    %38 = vector.broadcast %17 : vector<1x32xf32> to vector<32x32xf32>
    %39 = arith.addf %37, %38 : vector<32x32xf32>
    %40 = arith.truncf %39 : vector<32x32xf32> to vector<32x32xbf16>
    %cst_20 = arith.constant dense<0.000000e+00> : vector<32x96xf32>
    %41 = tpu.matmul %40, %11, %cst_20 {dimension_numbers = #tpu.dot_dimension_numbers<[1], [0], [0], [1], [0, 0, 1, 1], [], []>} : vector<32x32xbf16>, vector<32x96xbf16>, vector<32x96xf32> -> vector<32x96xf32>
    %c0_21 = arith.constant 0 : index
    %c0_22 = arith.constant 0 : index
    %c0_23 = arith.constant 0 : index
    %42 = vector.load %arg10[%c0_21, %c0_22, %c0_23] : memref<1x1x96xf32, #tpu.memory_space<vmem>>, vector<1x1x96xf32>
    %43 = vector.shape_cast %42 : vector<1x1x96xf32> to vector<1x96xf32>
    %44 = vector.broadcast %43 : vector<1x96xf32> to vector<32x96xf32>
    %45 = arith.addf %41, %44 : vector<32x96xf32>
    %46 = vector.extract_strided_slice %45 {offsets = [0, 0], sizes = [32, 32], strides = [1, 1]} : vector<32x96xf32> to vector<32x32xf32>
    %cst_24 = arith.constant 0.353553385 : f32
    %47 = vector.broadcast %cst_24 : f32 to vector<32x32xf32>
    %48 = arith.mulf %46, %47 : vector<32x32xf32>
    %49 = vector.extract_strided_slice %45 {offsets = [0, 32], sizes = [32, 32], strides = [1, 1]} : vector<32x96xf32> to vector<32x32xf32>
    %50 = vector.extract_strided_slice %45 {offsets = [0, 64], sizes = [32, 32], strides = [1, 1]} : vector<32x96xf32> to vector<32x32xf32>
    %51 = vector.extract_strided_slice %48 {offsets = [0, 0], sizes = [32, 8], strides = [1, 1]} : vector<32x32xf32> to vector<32x8xf32>
    %52 = arith.truncf %51 : vector<32x8xf32> to vector<32x8xbf16>
    %53 = vector.extract_strided_slice %49 {offsets = [0, 0], sizes = [32, 8], strides = [1, 1]} : vector<32x32xf32> to vector<32x8xf32>
    %54 = arith.truncf %53 : vector<32x8xf32> to vector<32x8xbf16>
    %cst_25 = arith.constant dense<0.000000e+00> : vector<32x32xf32>
    %55 = tpu.matmul %52, %54, %cst_25 {dimension_numbers = #tpu.dot_dimension_numbers<[1], [1], [0], [0], [0, 0, 1, 0], [], []>} : vector<32x8xbf16>, vector<32x8xbf16>, vector<32x32xf32> -> vector<32x32xf32>
    %56 = arith.addf %55, %8 : vector<32x32xf32>
    %cst_26 = arith.constant dense<0xFF800000> : vector<32xf32>
    %57 = vector.multi_reduction <maximumf>, %56, %cst_26 [1] : vector<32x32xf32> to vector<32xf32>
    %58 = vector.shape_cast %57 : vector<32xf32> to vector<32x1xf32>
    %59 = vector.broadcast %58 : vector<32x1xf32> to vector<32x32xf32>
    %60 = arith.subf %56, %59 : vector<32x32xf32>
    %61 = math.exp %60 : vector<32x32xf32>
    %cst_27 = arith.constant dense<0.000000e+00> : vector<32xf32>
    %62 = vector.multi_reduction <add>, %61, %cst_27 [1] : vector<32x32xf32> to vector<32xf32>
    %63 = vector.shape_cast %62 : vector<32xf32> to vector<32x1xf32>
    %64 = tpu.reciprocal %63 {approx = true} : vector<32x1xf32> -> vector<32x1xf32>
    %65 = vector.broadcast %64 : vector<32x1xf32> to vector<32x32xf32>
    %66 = arith.mulf %61, %65 : vector<32x32xf32>
    %67 = arith.truncf %66 : vector<32x32xf32> to vector<32x32xbf16>
    %68 = vector.extract_strided_slice %50 {offsets = [0, 0], sizes = [32, 8], strides = [1, 1]} : vector<32x32xf32> to vector<32x8xf32>
    %69 = arith.truncf %68 : vector<32x8xf32> to vector<32x8xbf16>
    %70 = vector.extract_strided_slice %13 {offsets = [0, 0], sizes = [8, 32], strides = [1, 1]} : vector<32x32xbf16> to vector<8x32xbf16>
    %cst_28 = arith.constant dense<0.000000e+00> : vector<32x32xf32>
    %71 = tpu.matmul %69, %70, %cst_28 {dimension_numbers = #tpu.dot_dimension_numbers<[1], [0], [0], [1], [0, 0, 1, 1], [], []>} : vector<32x8xbf16>, vector<8x32xbf16>, vector<32x32xf32> -> vector<32x32xf32>
    %72 = arith.truncf %71 : vector<32x32xf32> to vector<32x32xbf16>
    %73 = vector.extract_strided_slice %48 {offsets = [0, 8], sizes = [32, 8], strides = [1, 1]} : vector<32x32xf32> to vector<32x8xf32>
    %74 = arith.truncf %73 : vector<32x8xf32> to vector<32x8xbf16>
    %75 = vector.extract_strided_slice %49 {offsets = [0, 8], sizes = [32, 8], strides = [1, 1]} : vector<32x32xf32> to vector<32x8xf32>
    %76 = arith.truncf %75 : vector<32x8xf32> to vector<32x8xbf16>
    %cst_29 = arith.constant dense<0.000000e+00> : vector<32x32xf32>
    %77 = tpu.matmul %74, %76, %cst_29 {dimension_numbers = #tpu.dot_dimension_numbers<[1], [1], [0], [0], [0, 0, 1, 0], [], []>} : vector<32x8xbf16>, vector<32x8xbf16>, vector<32x32xf32> -> vector<32x32xf32>
    %78 = arith.addf %77, %8 : vector<32x32xf32>
    %cst_30 = arith.constant dense<0xFF800000> : vector<32xf32>
    %79 = vector.multi_reduction <maximumf>, %78, %cst_30 [1] : vector<32x32xf32> to vector<32xf32>
    %80 = vector.shape_cast %79 : vector<32xf32> to vector<32x1xf32>
    %81 = vector.broadcast %80 : vector<32x1xf32> to vector<32x32xf32>
    %82 = arith.subf %78, %81 : vector<32x32xf32>
    %83 = math.exp %82 : vector<32x32xf32>
    %cst_31 = arith.constant dense<0.000000e+00> : vector<32xf32>
    %84 = vector.multi_reduction <add>, %83, %cst_31 [1] : vector<32x32xf32> to vector<32xf32>
    %85 = vector.shape_cast %84 : vector<32xf32> to vector<32x1xf32>
    %86 = tpu.reciprocal %85 {approx = true} : vector<32x1xf32> -> vector<32x1xf32>
    %87 = vector.broadcast %86 : vector<32x1xf32> to vector<32x32xf32>
    %88 = arith.mulf %83, %87 : vector<32x32xf32>
    %89 = arith.truncf %88 : vector<32x32xf32> to vector<32x32xbf16>
    %90 = vector.extract_strided_slice %50 {offsets = [0, 8], sizes = [32, 8], strides = [1, 1]} : vector<32x32xf32> to vector<32x8xf32>
    %91 = arith.truncf %90 : vector<32x8xf32> to vector<32x8xbf16>
    %92 = vector.extract_strided_slice %13 {offsets = [8, 0], sizes = [8, 32], strides = [1, 1]} : vector<32x32xbf16> to vector<8x32xbf16>
    %cst_32 = arith.constant dense<0.000000e+00> : vector<32x32xf32>
    %93 = tpu.matmul %91, %92, %cst_32 {dimension_numbers = #tpu.dot_dimension_numbers<[1], [0], [0], [1], [0, 0, 1, 1], [], []>} : vector<32x8xbf16>, vector<8x32xbf16>, vector<32x32xf32> -> vector<32x32xf32>
    %94 = arith.truncf %93 : vector<32x32xf32> to vector<32x32xbf16>
    %95 = vector.extract_strided_slice %48 {offsets = [0, 16], sizes = [32, 8], strides = [1, 1]} : vector<32x32xf32> to vector<32x8xf32>
    %96 = arith.truncf %95 : vector<32x8xf32> to vector<32x8xbf16>
    %97 = vector.extract_strided_slice %49 {offsets = [0, 16], sizes = [32, 8], strides = [1, 1]} : vector<32x32xf32> to vector<32x8xf32>
    %98 = arith.truncf %97 : vector<32x8xf32> to vector<32x8xbf16>
    %cst_33 = arith.constant dense<0.000000e+00> : vector<32x32xf32>
    %99 = tpu.matmul %96, %98, %cst_33 {dimension_numbers = #tpu.dot_dimension_numbers<[1], [1], [0], [0], [0, 0, 1, 0], [], []>} : vector<32x8xbf16>, vector<32x8xbf16>, vector<32x32xf32> -> vector<32x32xf32>
    %100 = arith.addf %99, %8 : vector<32x32xf32>
    %cst_34 = arith.constant dense<0xFF800000> : vector<32xf32>
    %101 = vector.multi_reduction <maximumf>, %100, %cst_34 [1] : vector<32x32xf32> to vector<32xf32>
    %102 = vector.shape_cast %101 : vector<32xf32> to vector<32x1xf32>
    %103 = vector.broadcast %102 : vector<32x1xf32> to vector<32x32xf32>
    %104 = arith.subf %100, %103 : vector<32x32xf32>
    %105 = math.exp %104 : vector<32x32xf32>
    %cst_35 = arith.constant dense<0.000000e+00> : vector<32xf32>
    %106 = vector.multi_reduction <add>, %105, %cst_35 [1] : vector<32x32xf32> to vector<32xf32>
    %107 = vector.shape_cast %106 : vector<32xf32> to vector<32x1xf32>
    %108 = tpu.reciprocal %107 {approx = true} : vector<32x1xf32> -> vector<32x1xf32>
    %109 = vector.broadcast %108 : vector<32x1xf32> to vector<32x32xf32>
    %110 = arith.mulf %105, %109 : vector<32x32xf32>
    %111 = arith.truncf %110 : vector<32x32xf32> to vector<32x32xbf16>
    %112 = vector.extract_strided_slice %50 {offsets = [0, 16], sizes = [32, 8], strides = [1, 1]} : vector<32x32xf32> to vector<32x8xf32>
    %113 = arith.truncf %112 : vector<32x8xf32> to vector<32x8xbf16>
    %114 = vector.extract_strided_slice %13 {offsets = [16, 0], sizes = [8, 32], strides = [1, 1]} : vector<32x32xbf16> to vector<8x32xbf16>
    %cst_36 = arith.constant dense<0.000000e+00> : vector<32x32xf32>
    %115 = tpu.matmul %113, %114, %cst_36 {dimension_numbers = #tpu.dot_dimension_numbers<[1], [0], [0], [1], [0, 0, 1, 1], [], []>} : vector<32x8xbf16>, vector<8x32xbf16>, vector<32x32xf32> -> vector<32x32xf32>
    %116 = arith.truncf %115 : vector<32x32xf32> to vector<32x32xbf16>
    %117 = vector.extract_strided_slice %48 {offsets = [0, 24], sizes = [32, 8], strides = [1, 1]} : vector<32x32xf32> to vector<32x8xf32>
    %118 = arith.truncf %117 : vector<32x8xf32> to vector<32x8xbf16>
    %119 = vector.extract_strided_slice %49 {offsets = [0, 24], sizes = [32, 8], strides = [1, 1]} : vector<32x32xf32> to vector<32x8xf32>
    %120 = arith.truncf %119 : vector<32x8xf32> to vector<32x8xbf16>
    %cst_37 = arith.constant dense<0.000000e+00> : vector<32x32xf32>
    %121 = tpu.matmul %118, %120, %cst_37 {dimension_numbers = #tpu.dot_dimension_numbers<[1], [1], [0], [0], [0, 0, 1, 0], [], []>} : vector<32x8xbf16>, vector<32x8xbf16>, vector<32x32xf32> -> vector<32x32xf32>
    %122 = arith.addf %121, %8 : vector<32x32xf32>
    %cst_38 = arith.constant dense<0xFF800000> : vector<32xf32>
    %123 = vector.multi_reduction <maximumf>, %122, %cst_38 [1] : vector<32x32xf32> to vector<32xf32>
    %124 = vector.shape_cast %123 : vector<32xf32> to vector<32x1xf32>
    %125 = vector.broadcast %124 : vector<32x1xf32> to vector<32x32xf32>
    %126 = arith.subf %122, %125 : vector<32x32xf32>
    %127 = math.exp %126 : vector<32x32xf32>
    %cst_39 = arith.constant dense<0.000000e+00> : vector<32xf32>
    %128 = vector.multi_reduction <add>, %127, %cst_39 [1] : vector<32x32xf32> to vector<32xf32>
    %129 = vector.shape_cast %128 : vector<32xf32> to vector<32x1xf32>
    %130 = tpu.reciprocal %129 {approx = true} : vector<32x1xf32> -> vector<32x1xf32>
    %131 = vector.broadcast %130 : vector<32x1xf32> to vector<32x32xf32>
    %132 = arith.mulf %127, %131 : vector<32x32xf32>
    %133 = arith.truncf %132 : vector<32x32xf32> to vector<32x32xbf16>
    %134 = vector.extract_strided_slice %50 {offsets = [0, 24], sizes = [32, 8], strides = [1, 1]} : vector<32x32xf32> to vector<32x8xf32>
    %135 = arith.truncf %134 : vector<32x8xf32> to vector<32x8xbf16>
    %136 = vector.extract_strided_slice %13 {offsets = [24, 0], sizes = [8, 32], strides = [1, 1]} : vector<32x32xbf16> to vector<8x32xbf16>
    %cst_40 = arith.constant dense<0.000000e+00> : vector<32x32xf32>
    %137 = tpu.matmul %135, %136, %cst_40 {dimension_numbers = #tpu.dot_dimension_numbers<[1], [0], [0], [1], [0, 0, 1, 1], [], []>} : vector<32x8xbf16>, vector<8x32xbf16>, vector<32x32xf32> -> vector<32x32xf32>
    %138 = arith.truncf %137 : vector<32x32xf32> to vector<32x32xbf16>
    %139 = tpu.concatenate %67, %89, %111, %133 in 1 : vector<32x32xbf16>, vector<32x32xbf16>, vector<32x32xbf16>, vector<32x32xbf16> -> vector<32x128xbf16>
    %140 = tpu.concatenate %72, %94, %116, %138 in 0 : vector<32x32xbf16>, vector<32x32xbf16>, vector<32x32xbf16>, vector<32x32xbf16> -> vector<128x32xbf16>
    %cst_41 = arith.constant dense<0.000000e+00> : vector<32x32xf32>
    %141 = tpu.matmul %139, %140, %cst_41 {dimension_numbers = #tpu.dot_dimension_numbers<[1], [0], [0], [1], [0, 0, 1, 1], [], []>} : vector<32x128xbf16>, vector<128x32xbf16>, vector<32x32xf32> -> vector<32x32xf32>
    %c0_42 = arith.constant 0 : index
    %c0_43 = arith.constant 0 : index
    %c0_44 = arith.constant 0 : index
    %142 = vector.load %arg12[%c0_42, %c0_43, %c0_44] : memref<1x1x32xf32, #tpu.memory_space<vmem>>, vector<1x1x32xf32>
    %143 = vector.shape_cast %142 : vector<1x1x32xf32> to vector<1x32xf32>
    %144 = vector.broadcast %143 : vector<1x32xf32> to vector<32x32xf32>
    %145 = arith.addf %141, %144 : vector<32x32xf32>
    %146 = arith.addf %9, %145 : vector<32x32xf32>
    %c0_45 = arith.constant 0 : index
    %c0_46 = arith.constant 0 : index
    %c0_47 = arith.constant 0 : index
    %147 = vector.load %arg13[%c0_45, %c0_46, %c0_47] : memref<1x1x32xf32, #tpu.memory_space<vmem>>, vector<1x1x32xf32>
    %148 = vector.shape_cast %147 : vector<1x1x32xf32> to vector<1x32xf32>
    %c0_48 = arith.constant 0 : index
    %c0_49 = arith.constant 0 : index
    %c0_50 = arith.constant 0 : index
    %149 = vector.load %arg14[%c0_48, %c0_49, %c0_50] : memref<1x1x32xf32, #tpu.memory_space<vmem>>, vector<1x1x32xf32>
    %150 = vector.shape_cast %149 : vector<1x1x32xf32> to vector<1x32xf32>
    %cst_51 = arith.constant dense<0.000000e+00> : vector<32xf32>
    %151 = vector.multi_reduction <add>, %146, %cst_51 [1] : vector<32x32xf32> to vector<32xf32>
    %152 = vector.shape_cast %151 : vector<32xf32> to vector<32x1xf32>
    %cst_52 = arith.constant 3.200000e+01 : f32
    %153 = vector.broadcast %cst_52 : f32 to vector<32x1xf32>
    %154 = arith.divf %152, %153 : vector<32x1xf32>
    %155 = vector.broadcast %154 : vector<32x1xf32> to vector<32x32xf32>
    %156 = arith.subf %146, %155 : vector<32x32xf32>
    %157 = arith.mulf %156, %156 : vector<32x32xf32>
    %cst_53 = arith.constant dense<0.000000e+00> : vector<32xf32>
    %158 = vector.multi_reduction <add>, %157, %cst_53 [1] : vector<32x32xf32> to vector<32xf32>
    %159 = vector.shape_cast %158 : vector<32xf32> to vector<32x1xf32>
    %cst_54 = arith.constant 3.200000e+01 : f32
    %160 = vector.broadcast %cst_54 : f32 to vector<32x1xf32>
    %161 = arith.divf %159, %160 : vector<32x1xf32>
    %162 = vector.broadcast %154 : vector<32x1xf32> to vector<32x32xf32>
    %163 = arith.subf %146, %162 : vector<32x32xf32>
    %cst_55 = arith.constant 9.99999997E-7 : f32
    %164 = vector.broadcast %cst_55 : f32 to vector<32x1xf32>
    %165 = arith.addf %161, %164 : vector<32x1xf32>
    %166 = math.rsqrt %165 : vector<32x1xf32>
    %167 = vector.broadcast %166 : vector<32x1xf32> to vector<32x32xf32>
    %168 = arith.mulf %163, %167 : vector<32x32xf32>
    %169 = vector.broadcast %148 : vector<1x32xf32> to vector<32x32xf32>
    %170 = arith.mulf %168, %169 : vector<32x32xf32>
    %171 = vector.broadcast %150 : vector<1x32xf32> to vector<32x32xf32>
    %172 = arith.addf %170, %171 : vector<32x32xf32>
    %173 = arith.truncf %172 : vector<32x32xf32> to vector<32x32xbf16>
    %c0_56 = arith.constant 0 : index
    %c0_57 = arith.constant 0 : index
    %c0_58 = arith.constant 0 : index
    %174 = vector.load %arg15[%c0_56, %c0_57, %c0_58] : memref<1x32x128xbf16, #tpu.memory_space<vmem>>, vector<1x32x128xbf16>
    %175 = vector.shape_cast %174 : vector<1x32x128xbf16> to vector<32x128xbf16>
    %cst_59 = arith.constant dense<0.000000e+00> : vector<32x128xf32>
    %176 = tpu.matmul %173, %175, %cst_59 {dimension_numbers = #tpu.dot_dimension_numbers<[1], [0], [0], [1], [0, 0, 1, 1], [], []>} : vector<32x32xbf16>, vector<32x128xbf16>, vector<32x128xf32> -> vector<32x128xf32>
    %c0_60 = arith.constant 0 : index
    %c0_61 = arith.constant 0 : index
    %c0_62 = arith.constant 0 : index
    %177 = vector.load %arg16[%c0_60, %c0_61, %c0_62] : memref<1x1x128xf32, #tpu.memory_space<vmem>>, vector<1x1x128xf32>
    %178 = vector.shape_cast %177 : vector<1x1x128xf32> to vector<1x128xf32>
    %179 = vector.broadcast %178 : vector<1x128xf32> to vector<32x128xf32>
    %180 = arith.addf %176, %179 : vector<32x128xf32>
    %181 = arith.mulf %180, %180 : vector<32x128xf32>
    %182 = arith.mulf %180, %181 : vector<32x128xf32>
    %cst_63 = arith.constant 4.471500e-02 : f32
    %183 = vector.broadcast %cst_63 : f32 to vector<32x128xf32>
    %184 = arith.mulf %183, %182 : vector<32x128xf32>
    %185 = arith.addf %180, %184 : vector<32x128xf32>
    %cst_64 = arith.constant 0.797884583 : f32
    %186 = vector.broadcast %cst_64 : f32 to vector<32x128xf32>
    %187 = arith.mulf %186, %185 : vector<32x128xf32>
    %188 = math.tanh %187 : vector<32x128xf32>
    %cst_65 = arith.constant 1.000000e+00 : f32
    %189 = vector.broadcast %cst_65 : f32 to vector<32x128xf32>
    %190 = arith.addf %189, %188 : vector<32x128xf32>
    %cst_66 = arith.constant 5.000000e-01 : f32
    %191 = vector.broadcast %cst_66 : f32 to vector<32x128xf32>
    %192 = arith.mulf %191, %190 : vector<32x128xf32>
    %193 = arith.mulf %180, %192 : vector<32x128xf32>
    %194 = arith.truncf %193 : vector<32x128xf32> to vector<32x128xbf16>
    %c0_67 = arith.constant 0 : index
    %c0_68 = arith.constant 0 : index
    %c0_69 = arith.constant 0 : index
    %195 = vector.load %arg17[%c0_67, %c0_68, %c0_69] : memref<1x128x32xbf16, #tpu.memory_space<vmem>>, vector<1x128x32xbf16>
    %196 = vector.shape_cast %195 : vector<1x128x32xbf16> to vector<128x32xbf16>
    %cst_70 = arith.constant dense<0.000000e+00> : vector<32x32xf32>
    %197 = tpu.matmul %194, %196, %cst_70 {dimension_numbers = #tpu.dot_dimension_numbers<[1], [0], [0], [1], [0, 0, 1, 1], [], []>} : vector<32x128xbf16>, vector<128x32xbf16>, vector<32x32xf32> -> vector<32x32xf32>
    %c0_71 = arith.constant 0 : index
    %c0_72 = arith.constant 0 : index
    %c0_73 = arith.constant 0 : index
    %198 = vector.load %arg18[%c0_71, %c0_72, %c0_73] : memref<1x1x32xf32, #tpu.memory_space<vmem>>, vector<1x1x32xf32>
    %199 = vector.shape_cast %198 : vector<1x1x32xf32> to vector<1x32xf32>
    %200 = vector.broadcast %199 : vector<1x32xf32> to vector<32x32xf32>
    %201 = arith.addf %197, %200 : vector<32x32xf32>
    %202 = arith.addf %146, %201 : vector<32x32xf32>
    %c0_74 = arith.constant 0 : index
    %c0_75 = arith.constant 0 : index
    %203 = vector.load %arg22[%c0_74, %c0_75] : memref<32x32xf32, #tpu.memory_space<vmem>>, vector<32x32xf32>
    tpu.vector_store %arg22[%c0_74, %c0_75], %202 {strides = array<i32>} : memref<32x32xf32, #tpu.memory_space<vmem>>, vector<32x32xf32>,
    %c1_i32 = arith.constant 1 : i32
    %204 = arith.cmpi eq, %arg1, %c1_i32 : i32
    %205 = arith.extui %204 : i1 to i32
    %c0_i32_76 = arith.constant 0 : i32
    %206 = arith.cmpi ne, %205, %c0_i32_76 : i32
    scf.if %206 {
      %c16 = arith.constant 16 : index
      %c0_77 = arith.constant 0 : index
      %207 = vector.load %arg22[%c16, %c0_77] : memref<32x32xf32, #tpu.memory_space<vmem>>, vector<1x32xf32>
      %c0_78 = arith.constant 0 : index
      %c0_79 = arith.constant 0 : index
      %208 = vector.load %arg19[%c0_78, %c0_79] : memref<1x32xf32, #tpu.memory_space<vmem>>, vector<1x32xf32>
      %c0_80 = arith.constant 0 : index
      %c0_81 = arith.constant 0 : index
      %209 = vector.load %arg20[%c0_80, %c0_81] : memref<1x32xf32, #tpu.memory_space<vmem>>, vector<1x32xf32>
      %cst_82 = arith.constant dense<0.000000e+00> : vector<1xf32>
      %210 = vector.multi_reduction <add>, %207, %cst_82 [1] : vector<1x32xf32> to vector<1xf32>
      %211 = vector.shape_cast %210 : vector<1xf32> to vector<1x1xf32>
      %cst_83 = arith.constant 3.200000e+01 : f32
      %212 = vector.broadcast %cst_83 : f32 to vector<1x1xf32>
      %213 = arith.divf %211, %212 : vector<1x1xf32>
      %214 = vector.broadcast %213 : vector<1x1xf32> to vector<1x32xf32>
      %215 = arith.subf %207, %214 : vector<1x32xf32>
      %216 = arith.mulf %215, %215 : vector<1x32xf32>
      %cst_84 = arith.constant dense<0.000000e+00> : vector<1xf32>
      %217 = vector.multi_reduction <add>, %216, %cst_84 [1] : vector<1x32xf32> to vector<1xf32>
      %218 = vector.shape_cast %217 : vector<1xf32> to vector<1x1xf32>
      %cst_85 = arith.constant 3.200000e+01 : f32
      %219 = vector.broadcast %cst_85 : f32 to vector<1x1xf32>
      %220 = arith.divf %218, %219 : vector<1x1xf32>
      %221 = vector.broadcast %213 : vector<1x1xf32> to vector<1x32xf32>
      %222 = arith.subf %207, %221 : vector<1x32xf32>
      %cst_86 = arith.constant 9.99999997E-7 : f32
      %223 = vector.broadcast %cst_86 : f32 to vector<1x1xf32>
      %224 = arith.addf %220, %223 : vector<1x1xf32>
      %225 = math.rsqrt %224 : vector<1x1xf32>
      %226 = vector.broadcast %225 : vector<1x1xf32> to vector<1x32xf32>
      %227 = arith.mulf %222, %226 : vector<1x32xf32>
      %228 = arith.mulf %227, %208 : vector<1x32xf32>
      %229 = arith.addf %228, %209 : vector<1x32xf32>
      %c0_87 = arith.constant 0 : index
      %c0_88 = arith.constant 0 : index
      %c0_89 = arith.constant 0 : index
      %230 = vector.load %arg21[%c0_87, %c0_88, %c0_89] : memref<1x1x32xf32, #tpu.memory_space<vmem>>, vector<1x1x32xf32>
      %231 = vector.shape_cast %230 : vector<1x1x32xf32> to vector<1x32xf32>
      %232 = vector.shape_cast %229 : vector<1x32xf32> to vector<1x1x32xf32>
      tpu.vector_store %arg21[%c0_87, %c0_88, %c0_89], %232 {strides = array<i32>} : memref<1x1x32xf32, #tpu.memory_space<vmem>>, vector<1x1x32xf32>,
    } else {
    }
    return
  }
  func.func @transform_0(%arg0: i32, %arg1: i32) -> (i32, i32) {
    %c0_i32 = arith.constant 0 : i32
    %c0_i32_0 = arith.constant 0 : i32
    return %arg0, %c0_i32 : i32, i32
  }
  func.func @transform_1(%arg0: i32, %arg1: i32) -> (i32, i32) {
    %c0_i32 = arith.constant 0 : i32
    %c0_i32_0 = arith.constant 0 : i32
    %c0_i32_1 = arith.constant 0 : i32
    return %c0_i32, %c0_i32_0 : i32, i32
  }
  func.func @transform_2(%arg0: i32, %arg1: i32) -> (i32, i32) {
    %c0_i32 = arith.constant 0 : i32
    %c0_i32_0 = arith.constant 0 : i32
    %c0_i32_1 = arith.constant 0 : i32
    return %c0_i32, %c0_i32_0 : i32, i32
  }
  func.func @transform_3(%arg0: i32, %arg1: i32) -> (i32, i32) {
    %c0_i32 = arith.constant 0 : i32
    %c0_i32_0 = arith.constant 0 : i32
    %c0_i32_1 = arith.constant 0 : i32
    return %c0_i32, %c0_i32_0 : i32, i32
  }
  func.func @transform_4(%arg0: i32, %arg1: i32) -> (i32, i32) {
    %c0_i32 = arith.constant 0 : i32
    %c0_i32_0 = arith.constant 0 : i32
    %c0_i32_1 = arith.constant 0 : i32
    return %c0_i32, %c0_i32_0 : i32, i32
  }
  func.func @transform_5(%arg0: i32, %arg1: i32) -> (i32, i32, i32) {
    %c0_i32 = arith.constant 0 : i32
    %c0_i32_0 = arith.constant 0 : i32
    %c0_i32_1 = arith.constant 0 : i32
    return %arg1, %c0_i32, %c0_i32_0 : i32, i32, i32
  }
  func.func @transform_6(%arg0: i32, %arg1: i32) -> (i32, i32, i32) {
    %c0_i32 = arith.constant 0 : i32
    %c0_i32_0 = arith.constant 0 : i32
    %c0_i32_1 = arith.constant 0 : i32
    return %arg1, %c0_i32, %c0_i32_0 : i32, i32, i32
  }
  func.func @transform_7(%arg0: i32, %arg1: i32) -> (i32, i32, i32) {
    %c0_i32 = arith.constant 0 : i32
    %c0_i32_0 = arith.constant 0 : i32
    %c0_i32_1 = arith.constant 0 : i32
    return %arg1, %c0_i32, %c0_i32_0 : i32, i32, i32
  }
  func.func @transform_8(%arg0: i32, %arg1: i32) -> (i32, i32, i32) {
    %c0_i32 = arith.constant 0 : i32
    %c0_i32_0 = arith.constant 0 : i32
    %c0_i32_1 = arith.constant 0 : i32
    return %arg1, %c0_i32, %c0_i32_0 : i32, i32, i32
  }
  func.func @transform_9(%arg0: i32, %arg1: i32) -> (i32, i32, i32) {
    %c0_i32 = arith.constant 0 : i32
    %c0_i32_0 = arith.constant 0 : i32
    %c0_i32_1 = arith.constant 0 : i32
    return %arg1, %c0_i32, %c0_i32_0 : i32, i32, i32
  }
  func.func @transform_10(%arg0: i32, %arg1: i32) -> (i32, i32, i32) {
    %c0_i32 = arith.constant 0 : i32
    %c0_i32_0 = arith.constant 0 : i32
    %c0_i32_1 = arith.constant 0 : i32
    return %arg1, %c0_i32, %c0_i32_0 : i32, i32, i32
  }
  func.func @transform_11(%arg0: i32, %arg1: i32) -> (i32, i32, i32) {
    %c0_i32 = arith.constant 0 : i32
    %c0_i32_0 = arith.constant 0 : i32
    %c0_i32_1 = arith.constant 0 : i32
    return %arg1, %c0_i32, %c0_i32_0 : i32, i32, i32
  }
  func.func @transform_12(%arg0: i32, %arg1: i32) -> (i32, i32, i32) {
    %c0_i32 = arith.constant 0 : i32
    %c0_i32_0 = arith.constant 0 : i32
    %c0_i32_1 = arith.constant 0 : i32
    return %arg1, %c0_i32, %c0_i32_0 : i32, i32, i32
  }
  func.func @transform_13(%arg0: i32, %arg1: i32) -> (i32, i32, i32) {
    %c0_i32 = arith.constant 0 : i32
    %c0_i32_0 = arith.constant 0 : i32
    %c0_i32_1 = arith.constant 0 : i32
    return %arg1, %c0_i32, %c0_i32_0 : i32, i32, i32
  }
  func.func @transform_14(%arg0: i32, %arg1: i32) -> (i32, i32, i32) {
    %c0_i32 = arith.constant 0 : i32
    %c0_i32_0 = arith.constant 0 : i32
    %c0_i32_1 = arith.constant 0 : i32
    return %arg1, %c0_i32, %c0_i32_0 : i32, i32, i32
  }
  func.func @transform_15(%arg0: i32, %arg1: i32) -> (i32, i32, i32) {
    %c0_i32 = arith.constant 0 : i32
    %c0_i32_0 = arith.constant 0 : i32
    %c0_i32_1 = arith.constant 0 : i32
    return %arg1, %c0_i32, %c0_i32_0 : i32, i32, i32
  }
  func.func @transform_16(%arg0: i32, %arg1: i32) -> (i32, i32, i32) {
    %c0_i32 = arith.constant 0 : i32
    %c0_i32_0 = arith.constant 0 : i32
    %c0_i32_1 = arith.constant 0 : i32
    return %arg1, %c0_i32, %c0_i32_0 : i32, i32, i32
  }
  func.func @transform_17(%arg0: i32, %arg1: i32) -> (i32, i32) {
    %c0_i32 = arith.constant 0 : i32
    %c0_i32_0 = arith.constant 0 : i32
    %c0_i32_1 = arith.constant 0 : i32
    return %c0_i32, %c0_i32_0 : i32, i32
  }
  func.func @transform_18(%arg0: i32, %arg1: i32) -> (i32, i32) {
    %c0_i32 = arith.constant 0 : i32
    %c0_i32_0 = arith.constant 0 : i32
    %c0_i32_1 = arith.constant 0 : i32
    return %c0_i32, %c0_i32_0 : i32, i32
  }
  func.func @transform_19(%arg0: i32, %arg1: i32) -> (i32, i32, i32) {
    %c0_i32 = arith.constant 0 : i32
    %c0_i32_0 = arith.constant 0 : i32
    %c0_i32_1 = arith.constant 0 : i32
    return %arg0, %c0_i32, %c0_i32_0 : i32, i32, i32
  }
}

</mosaic_0001>

<bundles_post_ra>
// kernel: tpu_custom_call.1
= control target key start
LH: loop header
LB: loop body
LE: loop exit
PB: predicated region body
PF: predicated region fallthrough
CT: control target
= control target key end

     0   :  { %s3809_s0 = inlined_call_operand.vmem [shape: bf16[32,192], index: 0, kind: input, shape index: {}]   ;;  %s3810_s1 = inlined_call_operand.vmem [shape: bf16[192,32], index: 1, kind: input, shape index: {}]   ;;  %s3811_s2 = inlined_call_operand.vmem [shape: f32[1,32], index: 2, kind: input, shape index: {}]   ;;  %s3812_s3 = inlined_call_operand.vmem [shape: f32[16,32], index: 3, kind: input, shape index: {}]   ;;  %s3813_s4 = inlined_call_operand.vmem [shape: f32[32,32], index: 4, kind: input, shape index: {}]   ;;  %s3814_s5 = inlined_call_operand.vmem [shape: f32[2,1,32], index: 5, kind: input, shape index: {}]   ;;  %s3815_s6 = inlined_call_operand.vmem [shape: f32[2,1,32], index: 6, kind: input, shape index: {}]   ;;  %s3816_s7 = inlined_call_operand.vmem [shape: bf16[2,32,96], index: 7, kind: input, shape index: {}]   ;;  %s3817_s8 = inlined_call_operand.vmem [shape: f32[2,1,96], index: 8, kind: input, shape index: {}]   ;;  %s3818_s9 = inlined_call_operand.vmem [shape: bf16[2,32,32], index: 9, kind: input, shape index: {}]   ;;  %s3819_s10 = inlined_call_operand.vmem [shape: f32[2,1,32], index: 10, kind: input, shape index: {}]   ;;  %s3820_s11 = inlined_call_operand.vmem [shape: f32[2,1,32], index: 11, kind: input, shape index: {}]   ;;  %s3821_s12 = inlined_call_operand.vmem [shape: f32[2,1,32], index: 12, kind: input, shape index: {}]   ;;  %s3822_s13 = inlined_call_operand.vmem [shape: bf16[2,32,128], index: 13, kind: input, shape index: {}]   ;;  %s3823_s14 = inlined_call_operand.vmem [shape: f32[2,1,128], index: 14, kind: input, shape index: {}]   ;;  %s3824_s15 = inlined_call_operand.vmem [shape: bf16[2,128,32], index: 15, kind: input, shape index: {}]   ;;  %s3825_s16 = inlined_call_operand.vmem [shape: f32[2,1,32], index: 16, kind: input, shape index: {}]   ;;  %s3826_s17 = inlined_call_operand.vmem [shape: f32[1,32], index: 17, kind: input, shape index: {}]   ;;  %s3827_s18 = inlined_call_operand.vmem [shape: f32[1,32], index: 18, kind: input, shape index: {}]   ;;  %s3828_s19 = inlined_call_operand.hbm [shape: f32[2,1,32], index: 19, kind: output, shape index: {}]  }
   0x1   :  { %3845 = sst [smem:[#allocation18_spill]] %s3809_s0 }
   0x2   :  { %3846 = sst [smem:[#allocation19_spill]] %s3810_s1 }
   0x3   :  { %3847 = sst [smem:[#allocation20_spill]] %s3811_s2 }
   0x4   :  { %3848 = sst [smem:[#allocation21_spill]] %s3812_s3 }
   0x5   :  { %3849 = sst [smem:[#allocation22_spill]] %s3813_s4 }
   0x6   :  { %3850 = sst [smem:[#allocation23_spill]] %s3815_s6 }
   0x7   :  { %3851 = sst [smem:[#allocation24_spill]] %s3816_s7 }
   0x8   :  { %3852 = sst [smem:[#allocation25_spill]] %s3818_s9 }
   0x9   :  { %3853 = sst [smem:[#allocation26_spill]] %s3826_s17 }
   0xa   :  { %3854 = sst [smem:[#allocation27_spill]] %s3827_s18 }
   0xb   :  { %3855 = sst [smem:[#allocation28_spill]] %s3828_s19 }
   0xc   :  { %24 = vsyncpa [#allocation4], 0 }
   0xd   :  { %26 = vsyncpa [#allocation4 + $0x1], 0  ;;  %s3200_s0 = smov 0   ;;  %s3202_s30 = smov 0  }
   0xe   :  { %s3204_s20 = smov 0   ;;  %s3206_s21 = smov 0  }
   0xf   :  { %s3208_s1 = smov 0   ;;  %s3210_s22 = smov 0  }
  0x10   :  { %s3212_s2 = smov 0   ;;  %s3214_s23 = smov 0  }
  0x11 LB: > { %3856 = sst [smem:[#allocation6_spill]] %s3055_s0  ;;  %s2521_s24 = sadd.s32 4294967295, %s3083_s23   ;;  %s3083_s23 = sphi %s3214_s23, %s32_s23   ;;  %s3079_s2 = sphi %s3212_s2, %s3906_s2   ;;  %s3075_s22 = sphi %s3210_s22, %s3905_s22   ;;  %s3071_s1 = sphi %s3208_s1, %s3904_s1   ;;  %s3067_s21 = sphi %s3206_s21, %s3903_s21   ;;  %s3063_s20 = sphi %s3204_s20, %s3902_s20   ;;  %s3059_s30 = sphi %s3202_s30, %s3908_s30   ;;  %s3055_s0 = sphi %s3200_s0, %s3907_s0  }
  0x12   : > { %3857 = sst [smem:[#allocation7_spill]] %s3063_s20  ;;  %s2522_s25 = sadd.s32 4294967294, %s3083_s23  }
  0x13   : > { %3858 = sst [smem:[#allocation8_spill]] %s3067_s21  ;;  %s41_s3 = sadd.s32 1, %s3075_s22 }
  0x14   : > { %3859 = sst [smem:[#allocation9_spill]] %s3071_s1  ;;  %p42_p0 = scmp.ge.s32.totalorder %s41_s3, 2 }
  0x15   : > { %3860 = sst [smem:[#allocation10_spill]] %s3075_s22  ;;  %s44_s26 = sadd.s32 1, %s3079_s2 }
  0x16   : > { %3861 = sst [smem:[#allocation11_spill]] %s3079_s2  ;;  %p525_p1 = scmp.ne.s32.totalorder %s3063_s20, %s3059_s30 }
  0x17   : > { %3862 = sst [smem:[#allocation12_spill]] %s3083_s23  ;;  %p526_p2 = scmp.eq.s32.totalorder %s2521_s24, 3 }
  0x18   : > { %s3910_s3 = smov (%p42_p0, %s41_s3), 0  ;;  %s3912_s26 = smov (!%p42_p0, %s44_s26), %s3079_s2 }
  0x19   : > { %3863 = sst [smem:[#allocation13_spill]] %s3910_s3  ;;  %p3249_p3 = por %p526_p2, %p525_p1 }
  0x1a   : > { %p531_p4 = scmp.ne.s32.totalorder %s3059_s30, %s3055_s0  ;;  %p46_p5 = scmp.ge.s32.totalorder %s3912_s26, 2 }
  0x1b   : > { %s3864_s27 = scalar_select %p3249_p3, 1, 0 }
  0x1c   : > { %p532_p6 = scmp.eq.s32.totalorder %s2522_s25, 3  ;;  %p2525_p7 = scmp.ge.s32.totalorder %s3083_s23, 1 }
  0x1d   : > { %3865 = sst [smem:[#allocation14_spill]] %s3864_s27  ;;  %p658_p8 = scmp.lt.s32.totalorder %s3083_s23, 5 }
  0x1e   : > { %s3914_s26 = smov (%p46_p5, %s3912_s26), 0  ;;  %p3259_p9 = por %p532_p6, %p531_p4 }
  0x1f   : > { %3866 = sst [smem:[#allocation15_spill]] %s3914_s26  ;;  %p659_p10 = pnand %p2525_p7, %p658_p8 }
  0x20   : > { %s3867_s28 = scalar_select %p3259_p9, 1, 0 }
  0x21   : > { %s512_s29 = ssub.s32 %s3079_s2, %s3914_s26  ;;  %s515_s24 = sadd.s32 1, %s3063_s20 }
  0x22   : > { %3868 = sst [smem:[#allocation16_spill]] %s3867_s28  ;;  %p513_p11 = scmp.eq.s32.totalorder %s512_s29, 0 }
  0x23   : > { %662 = sbr.rel (%p659_p10) target bundleno = 3038 (0xbde), region = 96  ;;  %s2526_s22 = sshll.u32 (!%p659_p10), %s3071_s1, 1 }
  0x24   : > { %s3267_s3 = scalar_select %p513_p11, %s3063_s20, %s515_s24  }
  0x25   : > { %p759_p12 = scmp.lt.s32.totalorder (!%p659_p10), %s2526_s22, 3  ;;  %p765_p13 = scmp.lt.s32.totalorder (!%p659_p10), %s3067_s21, 1 }
  0x26   : > { %3869 = sst [smem:[#allocation17_spill]] %s3267_s3  ;;  %s3872_s7 = sld [smem:[#allocation24_spill]] (!%p659_p10) }
  0x27   : > { %s3870_s25 = sld [smem:[#allocation18_spill]] (!%p659_p10)  ;;  %s3873_s9 = sld [smem:[#allocation25_spill]] (!%p659_p10) }
  0x28   : > { %s3874_s17 = sand.u32 (!%p659_p10), 1, %s3059_s30   ;;  %s3875_s6 = sld [smem:[#allocation8_spill]] (!%p659_p10) }
  0x29   : > { %s3336_s18 = scalar_lea.vmem (!%p659_p10), [#allocation3], %s3874_s17 }
  0x2a   : > { %s3916_s22 = smov (!%p759_p12, %s2526_s22), 3 }
  0x2b   : > { %s3273_s0 = scalar_select %p765_p13, %s3067_s21, 1 }
  0x2c   : > { %s2598_s29 = sshll.u32 %s3916_s22, 3 }
  0x2d   : > { %s3278_s2 = scalar_lea.vmem %s3870_s25, %s2598_s29  ;;  %s2599_s1 = sshll.u32 %s3273_s0, 4 }
  0x2e   : > { %s3292_s4 = scalar_lea.vmem %s3872_s7, %s2599_s1  ;;  %s3301_s24 = scalar_lea.vmem %s3873_s9, %s2599_s1 }
  0x2f   : > { %s3318_s22 = scalar_lea.vmem %s3822_s13, %s2599_s1  ;;  %s2602_s9 = sshll.u32 %s3273_s0, 6 }
  0x30   : > { %s3332_s28 = scalar_lea.vmem %s3824_s15, %s2602_s9  ;;  %p2537_p0 = scmp.ne.s32.totalorder %s3875_s6, 0 }
  0x31   : > { %s3876_s25 = sld [smem:[#allocation19_spill]] (!%p2537_p0)  ;;  %v3085_v1 = vmov (!%p2537_p0), 0   ;;  %vm928_vm0 = vcmask (!%p2537_p0), 523264   ;;  %v2882_v5 = vld [vmem:[%s3278_s2 + $0x4] ss:$8 sps:$4 sm:$0xff] (!%p2537_p0)   ;;  %s3877_s27 = sld [smem:[#allocation21_spill]] (!%p2537_p0) }
  0x32   : > { %813 = sbr.rel (%p2537_p0) target bundleno = 322 (0x142), region = 100  ;;  %932 = vmatprep.subr.bf16.mxu0 (!%p2537_p0), %v3085_v1  ;;  %2553 = vmatprep.mubr.msk.bf16.mxu0 (!%p2537_p0), %vm928_vm0, %v2882_v5  ;;  %v2880_v14 = vld [vmem:[%s3278_s2] ss:$8 sps:$4 sm:$0xff] (!%p2537_p0)   ;;  %s3878_s21 = sld [smem:[#allocation22_spill]] (!%p2537_p0)  ;;  %vm983_vm1 = vcmask (!%p2537_p0), 261120  }
  0x33   : > { %s3880_s20 = sld [smem:[#allocation20_spill]] (!%p2537_p0) }
  0x37   : > { %v2868_v0 = vld [vmem:[%s3876_s25] sm:$0xff] (!%p2537_p0)   ;;  %v2869_v2 = vld [vmem:[%s3876_s25 + $0x8] sm:$0xff] (!%p2537_p0)   ;;  %v2870_v3 = vld [vmem:[%s3876_s25 + $0x10] sm:$0xff] (!%p2537_p0)  }
  0x38   : > { %933 = vmatpush1.bf16.msra.mxu0 (!%p2537_p0), %v2868_v0  ;;  %v2871_v4 = vld [vmem:[%s3876_s25 + $0x18] sm:$0xff] (!%p2537_p0)   ;;  %v2872_v6 = vld [vmem:[%s3876_s25 + $0x20] sm:$0xff] (!%p2537_p0)   ;;  %v2873_v7 = vld [vmem:[%s3876_s25 + $0x28] sm:$0xff] (!%p2537_p0)   ;;  %s3879_s19 = smov (!%p2537_p0), %s3878_s21 }
  0x39   : > { %934 = vmatprep.subr.bf16.mxu0 %v3085_v1  ;;  %v2874_v8 = vld [vmem:[%s3876_s25 + $0x30] sm:$0xff]   ;;  %v2875_v9 = vld [vmem:[%s3876_s25 + $0x38] sm:$0xff]   ;;  %v2876_v10 = vld [vmem:[%s3876_s25 + $0x40] sm:$0xff]  }
  0x3a   : > { %v2877_v11 = vld [vmem:[%s3876_s25 + $0x48] sm:$0xff]   ;;  %v2878_v12 = vld [vmem:[%s3876_s25 + $0x50] sm:$0xff]   ;;  %v2879_v13 = vld [vmem:[%s3876_s25 + $0x58] sm:$0xff]  }
  0x3b   : > { %v973_v15 = vld [vmem:[%s3877_s27] sm:$0xff]  ;;  %v974_v16 = vld [vmem:[%s3877_s27 + $0x8] sm:$0xff]  ;;  %v977_v17 = vld [vmem:[%s3878_s21 + $0x10] sm:$0xff] }
  0x3c   : > { %935 = vmatpush1.bf16.msra.mxu0 %v2869_v2  ;;  %v978_v18 = vld [vmem:[%s3879_s19 + $0x18] sm:$0xff]  ;;  %v981_v19 = vadd.f32 %v977_v17, %v973_v15  ;;  %v2538_v21 = vld [vmem:[%s3880_s20] ss:$0 sm:$0xff]  ;;  %v976_v27 = vld [vmem:[%s3879_s19 + $0x8] sm:$0xff] }
  0x3d   : > { %936 = vmatprep.subr.bf16.mxu0 %v3085_v1  ;;  %v982_v20 = vadd.f32 %v978_v18, %v974_v16  ;;  %v975_v23 = vld [vmem:[%s3879_s19] sm:$0xff] }
  0x3e   : > { %986 = vst.msk [vmem:[#allocation2 + $0x10] sm:$0xff] %vm983_vm1, %v981_v19 }
  0x3f   : > { %987 = vst.msk [vmem:[#allocation2 + $0x18] sm:$0xff] %vm983_vm1, %v982_v20 }
  0x40   : > { %937 = vmatpush1.bf16.msra.mxu0 %v2870_v3 }
  0x41   : > { %938 = vmatprep.subr.bf16.mxu0 %v3085_v1 }
  0x44   : > { %939 = vmatpush1.bf16.msra.mxu0 %v2871_v4 }
  0x45   : > { %940 = vmatprep.subr.bf16.mxu0 %v3085_v1 }
  0x48   : > { %941 = vmatpush1.bf16.msra.mxu0 %v2872_v6 }
  0x49   : > { %942 = vmatprep.subr.bf16.mxu0 %v3085_v1 }
  0x4c   : > { %943 = vmatpush1.bf16.msra.mxu0 %v2873_v7 }
  0x4d   : > { %944 = vmatprep.subr.bf16.mxu0 %v3085_v1 }
  0x50   : > { %945 = vmatpush1.bf16.msra.mxu0 %v2874_v8 }
  0x51   : > { %946 = vmatprep.subr.bf16.mxu0 %v3085_v1 }
  0x54   : > { %947 = vmatpush1.bf16.msra.mxu0 %v2875_v9 }
  0x55   : > { %948 = vmatprep.subr.bf16.mxu0 %v3085_v1 }
  0x58   : > { %949 = vmatpush1.bf16.msra.mxu0 %v2876_v10 }
  0x59   : > { %950 = vmatprep.subr.bf16.mxu0 %v3085_v1 }
  0x5c   : > { %951 = vmatpush1.bf16.msra.mxu0 %v2877_v11 }
  0x5d   : > { %952 = vmatprep.subr.bf16.mxu0 %v3085_v1 }
  0x60   : > { %953 = vmatpush1.bf16.msra.mxu0 %v2878_v12 }
  0x61   : > { %954 = vmatprep.subr.bf16.mxu0 %v3085_v1 }
  0x64   : > { %955 = vmatpush1.bf16.msra.mxu0 %v2879_v13 }
  0x67   : > { %965 = vmatmul.mubr.bf16.vlgmr.msra.gmra.mrb[0].mxu0 %v2880_v14 }
 0x13a   : > { %v966_v22 = vpop.f32.mrb[0].mxu0 }
 0x13b   : > { %v967_v24 = vadd.f32 %v2538_v21, %v966_v22  ;;  %v968_v25 = vpop.f32.mrb[1].mxu0 }
 0x13c   : > { %v969_v26 = vpop.f32.mrb[2].mxu0 }
 0x13d   : > { %v979_v28 = vadd.f32 %v975_v23, %v967_v24  ;;  %v970_v29 = vadd.f32 %v2538_v21, %v969_v26  ;;  %v971_v30 = vpop.f32.mrb[3].mxu0 }
 0x13f   : > { %984 = vst.msk [vmem:[#allocation2] sm:$0xff] %vm983_vm1, %v979_v28  ;;  %v980_v31 = vadd.f32 %v976_v27, %v970_v29 }
 0x141   : > { %985 = vst.msk [vmem:[#allocation2 + $0x8] sm:$0xff] %vm983_vm1, %v980_v31 }
 0x142 PF: > { %vm1006_vm2 = vcmask 261120   ;;  %v994_v33 = vld [vmem:[#allocation2 + $0x10] sm:$0xff]  ;;  %v995_v37 = vld [vmem:[#allocation2 + $0x18] sm:$0xff]  ;;  %v2883_v60 = vld [vmem:[%s3292_s4] sm:$0xff]   ;;  %s3881_s17 = scalar_lea.vmem %s3814_s5, %s3273_s0  ;;  %s3882_s21 = sld [smem:[#allocation23_spill]]  ;;  %vm1288_vm3 = vcmask 1043456  }
 0x143   : > { %v1013_v36 = vsel %vm1006_vm2, %v994_v33, 0.0  ;;  %v1016_v39 = vsel %vm1006_vm2, %v995_v37, 0.0  ;;  %v2884_v61 = vld [vmem:[%s3292_s4 + $0x8] sm:$0xff]   ;;  %2659 = vmatprep.subr.bf16.mxu1 %v2883_v60  ;;  %v2554_v12 = vld [vmem:[%s3881_s17] ss:$0 sm:$0xff]  ;;  %s3884_s9 = scalar_lea.vmem %s3817_s8, %s3273_s0  ;;  %vm1170_vm4 = vcmask 64512  }
 0x144   : > { %1014 = vadd.xlane.f32.xlu1 %v1013_v36  ;;  %2660 = vmatpush3.bf16.msra.mxu1 %v2883_v60  ;;  %v1000_v30 = vld [vmem:[%s3301_s24] sm:$0xf]  ;;  %s3086_s3 = smov 64   ;;  %s3087_s23 = smov 96   ;;  %vm1911_vm6 = vcmask 785408   ;;  %vm1906_vm7 = vcmask 523264  }
 0x145   : > { %2661 = vmatprep.subr.bf16.mxu1 %v2884_v61  ;;  %2773 = vmatprep.subr.msk.bf16.mxu0 %vm1288_vm3, %v1000_v30  ;;  %v1290_v31 = vsel %vm1288_vm3, %v1000_v30, 0  ;;  %s3088_s7 = smov 88   ;;  %s3089_s4 = smov 120  }
 0x146   : > { %v992_v32 = vld [vmem:[#allocation2] sm:$0xff]  ;;  %2676 = vmatpush3.bf16.msra.mxu0 %v1290_v31  ;;  %s3090_s26 = smov 56   ;;  %s3091_s17 = smov 80  }
 0x147   : > { %v1007_v35 = vsel %vm1006_vm2, %v992_v32, 0.0  ;;  %s3092_s6 = smov 72   ;;  %s3093_s1 = smov 48  }
 0x148   : > { %v993_v34 = vld [vmem:[#allocation2 + $0x8] sm:$0xff]  ;;  %1008 = vadd.xlane.f32.xlu0 %v1007_v35  ;;  %1017 = vadd.xlane.f32.xlu1 %v1016_v39  ;;  %s3883_s2 = scalar_lea.vmem %s3882_s21, %s3273_s0  ;;  %s3094_s21 = smov 112  }
 0x149   : > { %v1010_v38 = vsel %vm1006_vm2, %v993_v34, 0.0  ;;  %2662 = vmatpush3.bf16.msra.mxu1 %v2884_v61  ;;  %v2555_v18 = vld [vmem:[%s3883_s2] ss:$0 sm:$0xff]  ;;  %s3095_s2 = smov 104   ;;  %s3096_s29 = smov 40  }
 0x14c   : > { %1011 = vadd.xlane.f32.xlu0 %v1010_v38 }
 0x1d1   : > { %v1015_v41 = vpop.xlane.xlu1 %1014 }
 0x1d2   : > { %v1022_v43 = vmul.f32 0.03125, %v1015_v41 }
 0x1d4   : > { %v1026_v45 = vsub.f32 %v994_v33, %v1022_v43 }
 0x1d5   : > { %v1009_v40 = vpop.xlane.xlu0 %1008  ;;  %v1018_v47 = vpop.xlane.xlu1 %1017 }
 0x1d6   : > { %v1020_v42 = vmul.f32 0.03125, %v1009_v40  ;;  %v1023_v49 = vmul.f32 0.03125, %v1018_v47  ;;  %v1030_v51 = vmul.f32 %v1026_v45, %v1026_v45 }
 0x1d8   : > { %v1024_v44 = vsub.f32 %v992_v32, %v1020_v42  ;;  %v1027_v53 = vsub.f32 %v995_v37, %v1023_v49  ;;  %v1038_v55 = vsel %vm1006_vm2, %v1030_v51, 0.0  ;;  %v2556_v32 = vld [vmem:[%s3884_s9] ss:$0 sm:$0xff] }
 0x1d9   : > { %v1012_v46 = vpop.xlane.xlu0 %1011 }
 0x1da   : > { %v1021_v48 = vmul.f32 0.03125, %v1012_v46  ;;  %v1028_v50 = vmul.f32 %v1024_v44, %v1024_v44  ;;  %v1031_v57 = vmul.f32 %v1027_v53, %v1027_v53 }
 0x1dc   : > { %v1025_v52 = vsub.f32 %v993_v34, %v1021_v48  ;;  %v1032_v54 = vsel %vm1006_vm2, %v1028_v50, 0.0  ;;  %v1041_v59 = vsel %vm1006_vm2, %v1031_v57, 0.0 }
 0x1dd   : > { %1033 = vadd.xlane.f32.xlu0 %v1032_v54 }
 0x1de   : > { %v1029_v56 = vmul.f32 %v1025_v52, %v1025_v52 }
 0x1e0   : > { %v1035_v58 = vsel %vm1006_vm2, %v1029_v56, 0.0  ;;  %v1001_v56 = vld [vmem:[%s3301_s24 + $0x4] sm:$0xf] }
 0x1e1   : > { %1039 = vadd.xlane.f32.xlu0 %v1038_v55  ;;  %1036 = vadd.xlane.f32.xlu1 %v1035_v58  ;;  %v1471_v61 = vsel %vm1288_vm3, %v1001_v56, 0 }
 0x1e5   : > { %1042 = vadd.xlane.f32.xlu1 %v1041_v59 }
 0x26a   : > { %v1034_v62 = vpop.xlane.xlu0 %1033 }
 0x26b   : > { %v1044_v63 = vmul.f32 0.03125, %v1034_v62 }
 0x26d   : > { %v1048_v0 = vadd.f32 1e-06, %v1044_v63 }
 0x26e   : > { %v1037_v1 = vpop.xlane.xlu1 %1036  ;;  %v1040_v2 = vpop.xlane.xlu0 %1039 }
 0x26f   : > { %2895 = vrsqrt.f32 %v1048_v0  ;;  %v1045_v3 = vmul.f32 0.03125, %v1037_v1  ;;  %v1046_v4 = vmul.f32 0.03125, %v1040_v2  ;;  %v1002_v0 = vld [vmem:[%s3301_s24 + $0x8] sm:$0xf] }
 0x271   : > { %v1049_v5 = vadd.f32 1e-06, %v1045_v3  ;;  %v1050_v6 = vadd.f32 1e-06, %v1046_v4  ;;  %v1650_v4 = vsel %vm1288_vm3, %v1002_v0, 0 }
 0x272   : > { %v1043_v7 = vpop.xlane.xlu1 %1042 }
 0x273   : > { %2897 = vrsqrt.f32 %v1049_v5  ;;  %v1047_v8 = vmul.f32 0.03125, %v1043_v7 }
 0x274   : > { %2899 = vrsqrt.f32 %v1050_v6 }
 0x275   : > { %v1051_v9 = vadd.f32 1e-06, %v1047_v8 }
 0x277   : > { %2901 = vrsqrt.f32 %v1051_v9 }
 0x279   : > { %v2896_v10 = vpop.eup %2895 }
 0x27a   : > { %v1056_v11 = vmul.f32 %v2896_v10, %v1024_v44 }
 0x27c   : > { %v1066_v16 = vmul.f32 %v2554_v12, %v1056_v11 }
 0x27d   : > { %v2898_v13 = vpop.eup %2897 }
 0x27e   : > { %v2900_v14 = vpop.eup %2899  ;;  %v1057_v15 = vmul.f32 %v2898_v13, %v1025_v52  ;;  %v1076_v22 = vadd.f32 %v2555_v18, %v1066_v16 }
 0x27f   : > { %v1058_v17 = vmul.f32 %v2900_v14, %v1026_v45 }
 0x280   : > { %v1067_v19 = vmul.f32 %v2554_v12, %v1057_v15 }
 0x281   : > { %v2902_v20 = vpop.eup %2901  ;;  %v1068_v24 = vmul.f32 %v2554_v12, %v1058_v17 }
 0x282   : > { %v1059_v21 = vmul.f32 %v2902_v20, %v1027_v53  ;;  %v1077_v23 = vadd.f32 %v2555_v18, %v1067_v19 }
 0x283   : > { %v1078_v27 = vadd.f32 %v2555_v18, %v1068_v24 }
 0x284   : > { %v1080_v25 = vpack.c.bf16 %v1077_v23, %v1076_v22  ;;  %v1069_v26 = vmul.f32 %v2554_v12, %v1059_v21  ;;  %v1003_v12 = vld [vmem:[%s3301_s24 + $0xc] sm:$0xf]  ;;  %s3098_s24 = smov 32  }
 0x285   : > { %v1829_v16 = vsel %vm1288_vm3, %v1003_v12, 0 }
 0x286   : > { %2663 = vmatprep.mubr.msk.bf16.mxu1 %vm1006_vm2, %v1080_v25  ;;  %v1079_v28 = vadd.f32 %v2555_v18, %v1069_v26 }
 0x288   : > { %v1081_v29 = vpack.c.bf16 %v1079_v28, %v1078_v27  ;;  %v988_v27 = vlaneseq }
 0x28a   : > { %2664 = vmatmul.mubr.msk.bf16.vlgmr.msra.gmra.mrb[0].mxu1 %vm1006_vm2, %v1081_v29  ;;  %v989_v29 = vand.u32 127, %v988_v27 }
 0x28c   : > { %vm990_vm5 = vcmp.lt.s32.totalorder %v989_v29, 17 }
 0x35d   : > { %v2665_v33 = vpop.f32.mrb[0].mxu1 }
 0x35e   : > { %v1150_v34 = vadd.f32 %v2665_v33, %v2556_v32  ;;  %v1141_v35 = vpop.f32.mrb[1].mxu1  ;;  %v3097_v33 = vmov -1e+30  }
 0x35f   : > { %v1142_v36 = vadd.f32 %v2556_v32, %v1141_v35  ;;  %v2666_v37 = vpop.f32.mrb[2].mxu1 }
 0x360   : > { %v1153_v38 = vadd.f32 %v2666_v37, %v2556_v32  ;;  %v1144_v39 = vpop.f32.mrb[3].mxu1  ;;  %v1158_v41 = vmul.f32 0.35355338, %v1150_v34 }
 0x361   : > { %v1145_v40 = vadd.f32 %v2556_v32, %v1144_v39  ;;  %v1156_v44 = vmul.f32 0.35355338, %v1142_v36 }
 0x362   : > { %v1159_v42 = vmul.f32 0.35355338, %v1153_v38  ;;  %v1163_v43 = vpack.c.bf16 %v1153_v38, %v1150_v34  ;;  %v3487_v34 = vsel %vm990_vm5, 0.0, %v3097_v33 }
 0x363   : > { %v1157_v45 = vmul.f32 0.35355338, %v1145_v40  ;;  %v1162_v46 = vpack.c.bf16 %v1145_v40, %v1142_v36 }
 0x364   : > { %v3428_v47 = vpack.c.bf16 %v1159_v42, %v1158_v41 }
 0x365   : > { %v1160_v48 = vpack.c.bf16 %v1157_v45, %v1156_v44  ;;  %1278 = vrot.lane.b32.xlu1 %v1162_v46, %s3086_s3  ;;  %1166 = vrot.lane.b32.xlu0 %v1162_v46, %s3087_s23 }
 0x367   : > { %2671 = vmatprep.mubr.msk.bf16.mxu1 %vm1170_vm4, %v1160_v48 }
 0x369   : > { %1349 = vrot.lane.b32.xlu1 %v1162_v46, %s3088_s7  ;;  %1168 = vrot.lane.b32.xlu0 %v1163_v43, %s3087_s23 }
 0x36d   : > { %1280 = vrot.lane.b32.xlu1 %v1163_v43, %s3086_s3  ;;  %1345 = vrot.lane.b32.xlu0 %v1160_v48, %s3089_s4 }
 0x371   : > { %1351 = vrot.lane.b32.xlu1 %v1163_v43, %s3088_s7  ;;  %1460 = vrot.lane.b32.xlu0 %v1162_v46, %s3090_s26  ;;  %s3886_s7 = scalar_lea.vmem %s3820_s11, %s3273_s0 }
 0x375   : > { %1347 = vrot.lane.b32.xlu1 %v3428_v47, %s3089_s4  ;;  %1462 = vrot.lane.b32.xlu0 %v1163_v43, %s3090_s26 }
 0x379   : > { %1528 = vrot.lane.b32.xlu1 %v1162_v46, %s3091_s17  ;;  %1707 = vrot.lane.b32.xlu0 %v1162_v46, %s3092_s6 }
 0x37d   : > { %1639 = vrot.lane.b32.xlu1 %v1162_v46, %s3093_s1  ;;  %1530 = vrot.lane.b32.xlu0 %v1163_v43, %s3091_s17  ;;  %s3887_s17 = scalar_lea.vmem %s3821_s12, %s3273_s0 }
 0x381   : > { %1641 = vrot.lane.b32.xlu1 %v1163_v43, %s3093_s1  ;;  %1524 = vrot.lane.b32.xlu0 %v1160_v48, %s3094_s21 }
 0x385   : > { %1709 = vrot.lane.b32.xlu1 %v1163_v43, %s3092_s6  ;;  %1703 = vrot.lane.b32.xlu0 %v1160_v48, %s3095_s2 }
 0x389   : > { %1526 = vrot.lane.b32.xlu1 %v3428_v47, %s3094_s21  ;;  %1818 = vrot.lane.b32.xlu0 %v1162_v46, %s3096_s29  ;;  %s3888_s21 = scalar_lea.vmem %s3823_s14, %s3273_s0 }
 0x38d   : > { %1705 = vrot.lane.b32.xlu1 %v3428_v47, %s3095_s2 }
 0x391   : > { %1820 = vrot.lane.b32.xlu1 %v1163_v43, %s3096_s29  ;;  %s3889_s29 = scalar_lea.vmem %s3825_s16, %s3273_s0 }
 0x3d7   : > { %v1279_v49 = vpop.permute.xlu1 %1278  ;;  %v1167_v50 = vpop.permute.xlu0 %1166 }
 0x3d8   : > { %v1178_v51 = vsel %vm1170_vm4, %v1167_v50, 0  ;;  %2771 = vmatprep.subr.msk.bf16.mxu1 %vm1170_vm4, %v1167_v50  ;;  %2677 = vmatprep.mubr.msk.bf16.mxu0 %vm1170_vm4, %v1279_v49 }
 0x3d9   : > { %2668 = vmatpush3.bf16.xpose.msra.mxu1 %v1178_v51 }
 0x3db   : > { %v1350_v52 = vpop.permute.xlu1 %1349  ;;  %v1169_v53 = vpop.permute.xlu0 %1168 }
 0x3dc   : > { %2772 = vmatprep.subr.msk.bf16.mxu1 %vm1170_vm4, %v1169_v53  ;;  %2774 = vmatprep.subr.msk.bf16.mxu0 %vm1170_vm4, %v1350_v52  ;;  %v1360_v57 = vsel %vm1170_vm4, %v1350_v52, 0  ;;  %v1181_v58 = vsel %vm1170_vm4, %v1169_v53, 0 }
 0x3df   : > { %v1281_v54 = vpop.permute.xlu1 %1280  ;;  %v1346_v55 = vpop.permute.xlu0 %1345 }
 0x3e0   : > { %2678 = vmatmul.mubr.msk.bf16.vlgmr.msra.gmra.mrb[0].mxu0 %vm1170_vm4, %v1281_v54 }
 0x3e1   : > { %2682 = vmatpush3.bf16.xpose.msra.mxu0 %v1360_v57  ;;  %2670 = vmatpush3.bf16.xpose.msra.mxu1 %v1181_v58 }
 0x3e2   : > { %2685 = vmatprep.mubr.msk.bf16.mxu0 %vm1170_vm4, %v1346_v55  ;;  %2776 = vmatprep.subr.msk.bf16.mxu1 %vm1288_vm3, %v1001_v56 }
 0x3e3   : > { %v1352_v59 = vpop.permute.xlu1 %1351  ;;  %v1461_v60 = vpop.permute.xlu0 %1460 }
 0x3e4   : > { %2775 = vmatprep.subr.msk.bf16.mxu0 %vm1170_vm4, %v1352_v59  ;;  %v1363_v1 = vsel %vm1170_vm4, %v1352_v59, 0 }
 0x3e7   : > { %v1348_v62 = vpop.permute.xlu1 %1347  ;;  %v1463_v63 = vpop.permute.xlu0 %1462 }
 0x3e8   : > { %2672 = vmatmul.mubr.msk.bf16.vlgmr.msra.gmra.mrb[4].mxu1 %vm1170_vm4, %v3428_v47 }
 0x3e9   : > { %2684 = vmatpush3.bf16.xpose.msra.mxu0 %v1363_v1  ;;  %2690 = vmatpush3.bf16.msra.mxu1 %v1471_v61 }
 0x3ea   : > { %2691 = vmatprep.mubr.msk.bf16.mxu1 %vm1170_vm4, %v1461_v60  ;;  %2779 = vmatprep.subr.msk.bf16.mxu0 %vm1288_vm3, %v1002_v0 }
 0x3eb   : > { %v1529_v2 = vpop.permute.xlu1 %1528  ;;  %v1708_v3 = vpop.permute.xlu0 %1707 }
 0x3ec   : > { %2777 = vmatprep.subr.msk.bf16.mxu1 %vm1170_vm4, %v1529_v2  ;;  %v1539_v7 = vsel %vm1170_vm4, %v1529_v2, 0  ;;  %v1718_v13 = vsel %vm1170_vm4, %v1708_v3, 0 }
 0x3ef   : > { %v1640_v5 = vpop.permute.xlu1 %1639  ;;  %v1531_v6 = vpop.permute.xlu0 %1530 }
 0x3f0   : > { %2686 = vmatmul.mubr.msk.bf16.vlgmr.msra.gmra.mrb[4].mxu0 %vm1170_vm4, %v1348_v62  ;;  %2692 = vmatmul.mubr.msk.bf16.vlgmr.msra.gmra.mrb[8].mxu1 %vm1170_vm4, %v1463_v63  ;;  %v1542_v14 = vsel %vm1170_vm4, %v1531_v6, 0 }
 0x3f1   : > { %2704 = vmatpush3.bf16.msra.mxu0 %v1650_v4  ;;  %2705 = vmatprep.mubr.msk.bf16.mxu0 %vm1170_vm4, %v1640_v5 }
 0x3f2   : > { %2780 = vmatprep.subr.msk.bf16.mxu0 %vm1170_vm4, %v1708_v3  ;;  %2696 = vmatpush3.bf16.xpose.msra.mxu1 %v1539_v7 }
 0x3f3   : > { %v1642_v8 = vpop.permute.xlu1 %1641  ;;  %v1525_v9 = vpop.permute.xlu0 %1524  ;;  %2778 = vmatprep.subr.msk.bf16.mxu1 %vm1170_vm4, %v1531_v6 }
 0x3f4   : > { %2699 = vmatprep.mubr.msk.bf16.mxu1 %vm1170_vm4, %v1525_v9 }
 0x3f7   : > { %v1710_v10 = vpop.permute.xlu1 %1709  ;;  %v1704_v11 = vpop.permute.xlu0 %1703 }
 0x3f8   : > { %2706 = vmatmul.mubr.msk.bf16.vlgmr.msra.gmra.mrb[8].mxu0 %vm1170_vm4, %v1642_v8  ;;  %v1721_v17 = vsel %vm1170_vm4, %v1710_v10, 0 }
 0x3f9   : > { %2713 = vmatprep.mubr.msk.bf16.mxu0 %vm1170_vm4, %v1704_v11 }
 0x3fa   : > { %2710 = vmatpush3.bf16.xpose.msra.mxu0 %v1718_v13  ;;  %2698 = vmatpush3.bf16.xpose.msra.mxu1 %v1542_v14 }
 0x3fb   : > { %2781 = vmatprep.subr.msk.bf16.mxu0 %vm1170_vm4, %v1710_v10  ;;  %2782 = vmatprep.subr.msk.bf16.mxu1 %vm1288_vm3, %v1003_v12  ;;  %v1527_v15 = vpop.permute.xlu1 %1526  ;;  %v1819_v18 = vpop.permute.xlu0 %1818 }
 0x3ff   : > { %v1706_v19 = vpop.permute.xlu1 %1705 }
 0x401   : > { %2700 = vmatmul.mubr.msk.bf16.vlgmr.msra.gmra.mrb[12].mxu1 %vm1170_vm4, %v1527_v15 }
 0x402   : > { %2712 = vmatpush3.bf16.xpose.msra.mxu0 %v1721_v17  ;;  %2719 = vmatprep.mubr.msk.bf16.mxu1 %vm1170_vm4, %v1819_v18 }
 0x403   : > { %2718 = vmatpush3.bf16.msra.mxu1 %v1829_v16  ;;  %v1821_v20 = vpop.permute.xlu1 %1820 }
 0x409   : > { %2714 = vmatmul.mubr.msk.bf16.vlgmr.msra.gmra.mrb[12].mxu0 %vm1170_vm4, %v1706_v19  ;;  %2720 = vmatmul.mubr.msk.bf16.vlgmr.msra.gmra.mrb[16].mxu1 %vm1170_vm4, %v1821_v20 }
 0x4b3   : > { %v2679_v21 = vpop.f32.mrb[0].mxu0 }
 0x4b4   : > { %v1326_v22 = vpop.f32.mrb[1].mxu0 }
 0x4b5   : > { %v2680_v23 = vpop.f32.mrb[2].mxu0 }
 0x4b6   : > { %v1342_v24 = vpack.c.bf16 %v2680_v23, %v2679_v21  ;;  %v1329_v25 = vpop.f32.mrb[3].mxu0 }
 0x4b7   : > { %v1341_v26 = vpack.c.bf16 %v1329_v25, %v1326_v22 }
 0x4b9   : > { %2723 = vmatprep.subr.bf16.mxu1 %v1341_v26 }
 0x4ba   : > { %2724 = vmatpush3.bf16.msra.mxu1 %v1341_v26 }
 0x4bb   : > { %v3479_v28 = vpop.f32.mrb[4].mxu1  ;;  %2725 = vmatprep.subr.bf16.mxu1 %v1342_v24 }
 0x4bc   : > { %v3481_v30 = vpop.f32.mrb[5].mxu1  ;;  %v3559_v27 = vadd.f32 %v3479_v28, %v3487_v34 }
 0x4bd   : > { %v3483_v31 = vpop.f32.mrb[6].mxu1  ;;  %v3547_v23 = vadd.f32 %v3481_v30, %v3487_v34 }
 0x4be   : > { %v3485_v32 = vpop.f32.mrb[7].mxu1  ;;  %2726 = vmatpush3.bf16.msra.mxu1 %v1342_v24  ;;  %v3565_v30 = vadd.f32 %v3483_v31, %v3487_v34  ;;  %v1238_v33 = vsel %vm1006_vm2, %v3559_v27, -inf }
 0x4bf   : > { %v3553_v25 = vadd.f32 %v3485_v32, %v3487_v34  ;;  %v1232_v29 = vsel %vm1006_vm2, %v3547_v23, -inf }
 0x4c0   : > { %v1241_v28 = vsel %vm1006_vm2, %v3565_v30, -inf }
 0x4c1   : > { %v1235_v32 = vsel %vm1006_vm2, %v3553_v25, -inf }
 0x4c3   : > { %v2687_v35 = vpop.f32.mrb[4].mxu0  ;;  %v2693_v36 = vpop.f32.mrb[8].mxu1 }
 0x4c4   : > { %v3490_v37 = vadd.f32 %v2687_v35, %v3487_v34  ;;  %v1399_v38 = vpop.f32.mrb[5].mxu0  ;;  %v1507_v39 = vpop.f32.mrb[9].mxu1 }
 0x4c5   : > { %v2688_v40 = vpop.f32.mrb[6].mxu0  ;;  %v2694_v41 = vpop.f32.mrb[10].mxu1  ;;  %v3493_v42 = vadd.f32 %v1399_v38, %v3487_v34 }
 0x4c6   : > { %v1402_v43 = vpop.f32.mrb[7].mxu0  ;;  %v1523_v44 = vpack.c.bf16 %v2694_v41, %v2693_v36  ;;  %v1510_v45 = vpop.f32.mrb[11].mxu1  ;;  %v1420_v46 = vsel %vm1006_vm2, %v3490_v37, -inf  ;;  %v3503_v50 = vadd.f32 %v2688_v40, %v3487_v34 }
 0x4c7   : > { %v3498_v47 = vadd.f32 %v1402_v43, %v3487_v34  ;;  %v1522_v48 = vpack.c.bf16 %v1510_v45, %v1507_v39  ;;  %1421 = vmax.xlane.f32.xlu0 %v1420_v46  ;;  %v1414_v51 = vsel %vm1006_vm2, %v3493_v42, -inf }
 0x4c8   : > { %v1423_v57 = vsel %vm1006_vm2, %v3503_v50, -inf }
 0x4c9   : > { %2727 = vmatprep.subr.bf16.mxu1 %v1522_v48  ;;  %v1417_v49 = vsel %vm1006_vm2, %v3498_v47, -inf }
 0x4ca   : > { %1418 = vmax.xlane.f32.xlu1 %v1417_v49  ;;  %2728 = vmatpush3.bf16.msra.mxu1 %v1522_v48 }
 0x4cb   : > { %v2707_v52 = vpop.f32.mrb[8].mxu0  ;;  %1415 = vmax.xlane.f32.xlu0 %v1414_v51  ;;  %2729 = vmatprep.subr.bf16.mxu1 %v1523_v44 }
 0x4cc   : > { %v1686_v53 = vpop.f32.mrb[9].mxu0 }
 0x4cd   : > { %v2708_v54 = vpop.f32.mrb[10].mxu0 }
 0x4ce   : > { %v1702_v55 = vpack.c.bf16 %v2708_v54, %v2707_v52  ;;  %v1689_v56 = vpop.f32.mrb[11].mxu0  ;;  %2730 = vmatpush3.bf16.msra.mxu1 %v1523_v44 }
 0x4cf   : > { %v1701_v58 = vpack.c.bf16 %v1689_v56, %v1686_v53  ;;  %1424 = vmax.xlane.f32.xlu0 %v1423_v57 }
 0x4d1   : > { %2731 = vmatprep.subr.bf16.mxu1 %v1701_v58 }
 0x4d2   : > { %2732 = vmatpush3.bf16.msra.mxu1 %v1701_v58 }
 0x4d3   : > { %2733 = vmatprep.subr.bf16.mxu1 %v1702_v55 }
 0x4d4   : > { %v2701_v59 = vpop.f32.mrb[12].mxu1 }
 0x4d5   : > { %v3510_v60 = vadd.f32 %v2701_v59, %v3487_v34  ;;  %v1578_v61 = vpop.f32.mrb[13].mxu1 }
 0x4d6   : > { %v2702_v62 = vpop.f32.mrb[14].mxu1  ;;  %2734 = vmatpush3.bf16.msra.mxu1 %v1702_v55  ;;  %v3513_v63 = vadd.f32 %v1578_v61, %v3487_v34 }
 0x4d7   : > { %v3516_v0 = vadd.f32 %v2702_v62, %v3487_v34  ;;  %v1581_v1 = vpop.f32.mrb[15].mxu1  ;;  %v1599_v2 = vsel %vm1006_vm2, %v3510_v60, -inf }
 0x4d8   : > { %1600 = vmax.xlane.f32.xlu0 %v1599_v2  ;;  %v3521_v3 = vadd.f32 %v1581_v1, %v3487_v34  ;;  %v1593_v5 = vsel %vm1006_vm2, %v3513_v63, -inf }
 0x4d9   : > { %v1602_v4 = vsel %vm1006_vm2, %v3516_v0, -inf }
 0x4da   : > { %1603 = vmax.xlane.f32.xlu1 %v1602_v4  ;;  %v1596_v10 = vsel %vm1006_vm2, %v3521_v3, -inf }
 0x4dc   : > { %v2715_v6 = vpop.f32.mrb[12].mxu0  ;;  %v2721_v7 = vpop.f32.mrb[16].mxu1  ;;  %1594 = vmax.xlane.f32.xlu0 %v1593_v5 }
 0x4dd   : > { %v1757_v8 = vpop.f32.mrb[13].mxu0  ;;  %v1865_v9 = vpop.f32.mrb[17].mxu1  ;;  %v3533_v17 = vadd.f32 %v2715_v6, %v3487_v34 }
 0x4de   : > { %v3530_v11 = vadd.f32 %v1757_v8, %v3487_v34  ;;  %v2716_v12 = vpop.f32.mrb[14].mxu0  ;;  %v2722_v13 = vpop.f32.mrb[18].mxu1  ;;  %1597 = vmax.xlane.f32.xlu1 %v1596_v10 }
 0x4df   : > { %v1760_v14 = vpop.f32.mrb[15].mxu0  ;;  %v1881_v15 = vpack.c.bf16 %v2722_v13, %v2721_v7  ;;  %v1868_v16 = vpop.f32.mrb[19].mxu1  ;;  %v3541_v21 = vadd.f32 %v2716_v12, %v3487_v34  ;;  %v1778_v24 = vsel %vm1006_vm2, %v3533_v17, -inf }
 0x4e0   : > { %v3536_v18 = vadd.f32 %v1760_v14, %v3487_v34  ;;  %v1880_v19 = vpack.c.bf16 %v1868_v16, %v1865_v9  ;;  %v1772_v20 = vsel %vm1006_vm2, %v3530_v11, -inf }
 0x4e1   : > { %1773 = vmax.xlane.f32.xlu0 %v1772_v20  ;;  %v1781_v26 = vsel %vm1006_vm2, %v3541_v21, -inf }
 0x4e2   : > { %2735 = vmatprep.subr.bf16.mxu1 %v1880_v19  ;;  %v1775_v22 = vsel %vm1006_vm2, %v3536_v18, -inf }
 0x4e3   : > { %1776 = vmax.xlane.f32.xlu1 %v1775_v22  ;;  %2736 = vmatpush3.bf16.msra.mxu1 %v1880_v19 }
 0x4e4   : > { %2737 = vmatprep.subr.bf16.mxu1 %v1881_v15 }
 0x4e5   : > { %1779 = vmax.xlane.f32.xlu0 %v1778_v24 }
 0x4e7   : > { %1782 = vmax.xlane.f32.xlu1 %v1781_v26  ;;  %2738 = vmatpush3.bf16.msra.mxu1 %v1881_v15 }
 0x4e9   : > { %1233 = vmax.xlane.f32.xlu0 %v1232_v29 }
 0x4eb   : > { %1236 = vmax.xlane.f32.xlu1 %v1235_v32 }
 0x4ed   : > { %1239 = vmax.xlane.f32.xlu0 %v1238_v33 }
 0x4ef   : > { %1242 = vmax.xlane.f32.xlu1 %v1241_v28 }
 0x554   : > { %v1422_v35 = vpop.xlane.xlu0 %1421 }
 0x555   : > { %v1428_v36 = vsub.f32 %v3490_v37, %v1422_v35 }
 0x557   : > { %v1434_v38 = vmul.f32 1.442695, %v1428_v36  ;;  %v1419_v39 = vpop.xlane.xlu1 %1418 }
 0x558   : > { %v1416_v40 = vpop.xlane.xlu0 %1415  ;;  %v1427_v34 = vsub.f32 %v3498_v47, %v1419_v39 }
 0x559   : > { %2903 = vpow2.f32 %v1434_v38  ;;  %v1426_v31 = vsub.f32 %v3493_v42, %v1416_v40 }
 0x55a   : > { %v1432_v45 = vmul.f32 1.442695, %v1427_v34 }
 0x55b   : > { %v1430_v41 = vmul.f32 1.442695, %v1426_v31 }
 0x55c   : > { %v1425_v43 = vpop.xlane.xlu0 %1424 }
 0x55d   : > { %2905 = vpow2.f32 %v1430_v41  ;;  %v1429_v44 = vsub.f32 %v3503_v50, %v1425_v43 }
 0x55f   : > { %v1436_v46 = vmul.f32 1.442695, %v1429_v44 }
 0x561   : > { %2907 = vpow2.f32 %v1436_v46 }
 0x562   : > { %2909 = vpow2.f32 %v1432_v45 }
 0x563   : > { %v3577_v48 = vpop.eup %2903 }
 0x564   : > { %v1444_v37 = vsel %vm1006_vm2, %v3577_v48, 0.0 }
 0x565   : > { %1445 = vadd.xlane.f32.xlu0 %v1444_v37  ;;  %v1601_v49 = vpop.xlane.xlu0 %1600 }
 0x566   : > { %v1607_v42 = vsub.f32 %v3510_v60, %v1601_v49 }
 0x567   : > { %v3582_v51 = vpop.eup %2905  ;;  %v1604_v47 = vpop.xlane.xlu1 %1603 }
 0x568   : > { %v1613_v52 = vmul.f32 1.442695, %v1607_v42  ;;  %v1608_v53 = vsub.f32 %v3516_v0, %v1604_v47  ;;  %v1438_v50 = vsel %vm1006_vm2, %v3582_v51, 0.0 }
 0x569   : > { %1439 = vadd.xlane.f32.xlu0 %v1438_v50  ;;  %v1595_v54 = vpop.xlane.xlu0 %1594 }
 0x56a   : > { %2911 = vpow2.f32 %v1613_v52  ;;  %v1615_v55 = vmul.f32 1.442695, %v1608_v53  ;;  %v1605_v56 = vsub.f32 %v3513_v63, %v1595_v54 }
 0x56b   : > { %v3588_v57 = vpop.eup %2907  ;;  %v1598_v58 = vpop.xlane.xlu1 %1597 }
 0x56c   : > { %2913 = vpow2.f32 %v1615_v55  ;;  %v1609_v59 = vmul.f32 1.442695, %v1605_v56  ;;  %v1606_v60 = vsub.f32 %v3521_v3, %v1598_v58  ;;  %v1447_v61 = vsel %vm1006_vm2, %v3588_v57, 0.0  ;;  %v3593_v62 = vpop.eup %2909 }
 0x56d   : > { %1448 = vadd.xlane.f32.xlu1 %v1447_v61  ;;  %v1441_v4 = vsel %vm1006_vm2, %v3593_v62, 0.0 }
 0x56e   : > { %2915 = vpow2.f32 %v1609_v59  ;;  %v1611_v0 = vmul.f32 1.442695, %v1606_v60  ;;  %v1774_v1 = vpop.xlane.xlu0 %1773 }
 0x56f   : > { %v1784_v2 = vsub.f32 %v3530_v11, %v1774_v1 }
 0x570   : > { %2917 = vpow2.f32 %v1611_v0  ;;  %v1777_v63 = vpop.xlane.xlu1 %1776 }
 0x571   : > { %v1788_v5 = vmul.f32 1.442695, %v1784_v2  ;;  %v1785_v6 = vsub.f32 %v3536_v18, %v1777_v63  ;;  %1442 = vadd.xlane.f32.xlu1 %v1441_v4 }
 0x572   : > { %v1780_v3 = vpop.xlane.xlu0 %1779 }
 0x573   : > { %2919 = vpow2.f32 %v1788_v5  ;;  %v1790_v7 = vmul.f32 1.442695, %v1785_v6  ;;  %v1786_v8 = vsub.f32 %v3533_v17, %v1780_v3 }
 0x574   : > { %v3600_v9 = vpop.eup %2911  ;;  %v1783_v10 = vpop.xlane.xlu1 %1782 }
 0x575   : > { %2921 = vpow2.f32 %v1790_v7  ;;  %v1792_v12 = vmul.f32 1.442695, %v1786_v8  ;;  %v1787_v11 = vsub.f32 %v3541_v21, %v1783_v10  ;;  %v1623_v13 = vsel %vm1006_vm2, %v3600_v9, 0.0 }
 0x576   : > { %v3605_v14 = vpop.eup %2913  ;;  %v1234_v15 = vpop.xlane.xlu0 %1233  ;;  %1624 = vadd.xlane.f32.xlu0 %v1623_v13 }
 0x577   : > { %2923 = vpow2.f32 %v1792_v12  ;;  %v1794_v16 = vmul.f32 1.442695, %v1787_v11  ;;  %v1244_v18 = vsub.f32 %v3547_v23, %v1234_v15  ;;  %v1626_v17 = vsel %vm1006_vm2, %v3605_v14, 0.0 }
 0x578   : > { %v3610_v19 = vpop.eup %2915  ;;  %v1237_v20 = vpop.xlane.xlu1 %1236  ;;  %1627 = vadd.xlane.f32.xlu1 %v1626_v17 }
 0x579   : > { %2925 = vpow2.f32 %v1794_v16  ;;  %v1248_v21 = vmul.f32 1.442695, %v1244_v18  ;;  %v1245_v22 = vsub.f32 %v3553_v25, %v1237_v20  ;;  %v1617_v24 = vsel %vm1006_vm2, %v3610_v19, 0.0 }
 0x57a   : > { %v3615_v26 = vpop.eup %2917  ;;  %v1240_v29 = vpop.xlane.xlu0 %1239  ;;  %1618 = vadd.xlane.f32.xlu0 %v1617_v24 }
 0x57b   : > { %2927 = vpow2.f32 %v1248_v21  ;;  %v1250_v23 = vmul.f32 1.442695, %v1245_v22  ;;  %v1246_v32 = vsub.f32 %v3559_v27, %v1240_v29  ;;  %v1620_v33 = vsel %vm1006_vm2, %v3615_v26, 0.0 }
 0x57c   : > { %v1243_v28 = vpop.xlane.xlu1 %1242  ;;  %1621 = vadd.xlane.f32.xlu1 %v1620_v33 }
 0x57d   : > { %v3620_v35 = vpop.eup %2919  ;;  %2929 = vpow2.f32 %v1250_v23  ;;  %v1252_v25 = vmul.f32 1.442695, %v1246_v32  ;;  %v1247_v36 = vsub.f32 %v3565_v30, %v1243_v28 }
 0x57e   : > { %v1796_v38 = vsel %vm1006_vm2, %v3620_v35, 0.0 }
 0x57f   : > { %v3625_v39 = vpop.eup %2921  ;;  %2931 = vpow2.f32 %v1252_v25  ;;  %v1254_v40 = vmul.f32 1.442695, %v1247_v36  ;;  %1797 = vadd.xlane.f32.xlu0 %v1796_v38 }
 0x580   : > { %v1799_v27 = vsel %vm1006_vm2, %v3625_v39, 0.0 }
 0x581   : > { %v3629_v31 = vpop.eup %2923  ;;  %2933 = vpow2.f32 %v1254_v40  ;;  %1800 = vadd.xlane.f32.xlu1 %v1799_v27 }
 0x582   : > { %v1802_v34 = vsel %vm1006_vm2, %v3629_v31, 0.0 }
 0x583   : > { %v3633_v41 = vpop.eup %2925  ;;  %1803 = vadd.xlane.f32.xlu0 %v1802_v34 }
 0x584   : > { %v1805_v30 = vsel %vm1006_vm2, %v3633_v41, 0.0 }
 0x585   : > { %v3637_v43 = vpop.eup %2927  ;;  %1806 = vadd.xlane.f32.xlu1 %v1805_v30 }
 0x586   : > { %v1256_v44 = vsel %vm1006_vm2, %v3637_v43, 0.0 }
 0x587   : > { %v3641_v45 = vpop.eup %2929  ;;  %1257 = vadd.xlane.f32.xlu0 %v1256_v44 }
 0x588   : > { %v1259_v46 = vsel %vm1006_vm2, %v3641_v45, 0.0 }
 0x589   : > { %v3645_v37 = vpop.eup %2931  ;;  %1260 = vadd.xlane.f32.xlu1 %v1259_v46 }
 0x58a   : > { %v1262_v49 = vsel %vm1006_vm2, %v3645_v37, 0.0 }
 0x58b   : > { %v3649_v42 = vpop.eup %2933  ;;  %1263 = vadd.xlane.f32.xlu0 %v1262_v49 }
 0x58c   : > { %v1265_v47 = vsel %vm1006_vm2, %v3649_v42, 0.0 }
 0x58d   : > { %1266 = vadd.xlane.f32.xlu1 %v1265_v47 }
 0x5f2   : > { %v1446_v52 = vpop.xlane.xlu0 %1445 }
 0x5f3   : > { %2935 = vrcp.f32 %v1446_v52 }
 0x5f6   : > { %v1440_v53 = vpop.xlane.xlu0 %1439 }
 0x5fa   : > { %v1449_v50 = vpop.xlane.xlu1 %1448 }
 0x5fb   : > { %2937 = vrcp.f32 %v1449_v50 }
 0x5fc   : > { %2939 = vrcp.f32 %v1440_v53 }
 0x5fd   : > { %v2936_v55 = vpop.eup %2935 }
 0x5fe   : > { %v1443_v54 = vpop.xlane.xlu1 %1442  ;;  %v1456_v60 = vmul.f32 %v2936_v55, %v3577_v48 }
 0x5ff   : > { %2941 = vrcp.f32 %v1443_v54 }
 0x603   : > { %v1625_v56 = vpop.xlane.xlu0 %1624 }
 0x604   : > { %2943 = vrcp.f32 %v1625_v56 }
 0x605   : > { %v2938_v58 = vpop.eup %2937  ;;  %v1628_v59 = vpop.xlane.xlu1 %1627 }
 0x606   : > { %2945 = vrcp.f32 %v1628_v59  ;;  %v1457_v61 = vmul.f32 %v2938_v58, %v3588_v57  ;;  %v2940_v0 = vpop.eup %2939 }
 0x607   : > { %v1619_v1 = vpop.xlane.xlu0 %1618  ;;  %v1454_v5 = vmul.f32 %v2940_v0, %v3582_v51 }
 0x608   : > { %2947 = vrcp.f32 %v1619_v1  ;;  %v1459_v2 = vpack.c.bf16 %v1457_v61, %v1456_v60  ;;  %v2983_v1 = vld [vmem:[#allocation2] sm:$0xff] }
 0x609   : > { %v2942_v63 = vpop.eup %2941  ;;  %v1622_v4 = vpop.xlane.xlu1 %1621 }
 0x60a   : > { %2949 = vrcp.f32 %v1622_v4  ;;  %1886 = vrot.lane.b32.xlu1 %v1459_v2, %s3098_s24  ;;  %v1455_v6 = vmul.f32 %v2942_v63, %v3593_v62  ;;  %v2984_v4 = vld [vmem:[#allocation2 + $0x10] sm:$0xff] }
 0x60c   : > { %v1798_v3 = vpop.xlane.xlu0 %1797  ;;  %v1458_v7 = vpack.c.bf16 %v1455_v6, %v1454_v5 }
 0x60d   : > { %2951 = vrcp.f32 %v1798_v3  ;;  %v2985_v3 = vld [vmem:[#allocation2 + $0x8] sm:$0xff] }
 0x60e   : > { %v2944_v8 = vpop.eup %2943  ;;  %v1801_v48 = vpop.xlane.xlu1 %1800  ;;  %1884 = vrot.lane.b32.xlu0 %v1458_v7, %s3098_s24 }
 0x60f   : > { %2953 = vrcp.f32 %v1801_v48  ;;  %v1635_v12 = vmul.f32 %v2944_v8, %v3600_v9 }
 0x610   : > { %v2946_v57 = vpop.eup %2945  ;;  %v1804_v10 = vpop.xlane.xlu0 %1803 }
 0x611   : > { %2955 = vrcp.f32 %v1804_v10  ;;  %v1636_v11 = vmul.f32 %v2946_v57, %v3605_v14  ;;  %v2986_v57 = vld [vmem:[#allocation2 + $0x18] sm:$0xff] }
 0x612   : > { %v2948_v13 = vpop.eup %2947  ;;  %v1807_v15 = vpop.xlane.xlu1 %1806 }
 0x613   : > { %2957 = vrcp.f32 %v1807_v15  ;;  %v1638_v51 = vpack.c.bf16 %v1636_v11, %v1635_v12  ;;  %v1633_v62 = vmul.f32 %v2948_v13, %v3610_v19 }
 0x614   : > { %v2950_v16 = vpop.eup %2949  ;;  %v1258_v33 = vpop.xlane.xlu0 %1257 }
 0x615   : > { %1892 = vrot.lane.b32.xlu1 %v1638_v51, %s3086_s3  ;;  %v1634_v18 = vmul.f32 %v2950_v16, %v3615_v26 }
 0x616   : > { %v1261_v26 = vpop.xlane.xlu1 %1260 }
 0x617   : > { %v2952_v17 = vpop.eup %2951  ;;  %v1637_v20 = vpack.c.bf16 %v1634_v18, %v1633_v62  ;;  %2959 = vrcp.f32 %v1261_v26 }
 0x618   : > { %v1812_v9 = vmul.f32 %v2952_v17, %v3620_v35  ;;  %2961 = vrcp.f32 %v1258_v33  ;;  %v1264_v35 = vpop.xlane.xlu0 %1263 }
 0x619   : > { %v2954_v21 = vpop.eup %2953  ;;  %1890 = vrot.lane.b32.xlu1 %v1637_v20, %s3086_s3  ;;  %s3885_s3 = scalar_lea.vmem %s3819_s10, %s3273_s0  ;;  %s3890_s0 = sld [smem:[#allocation8_spill]] }
 0x61a   : > { %v1813_v14 = vmul.f32 %v2954_v21, %v3625_v39  ;;  %v1267_v28 = vpop.xlane.xlu1 %1266 }
 0x61b   : > { %v2956_v22 = vpop.eup %2955  ;;  %2963 = vrcp.f32 %v1267_v28 }
 0x61c   : > { %v1816_v24 = vpack.c.bf16 %v1813_v14, %v1812_v9  ;;  %v1814_v23 = vmul.f32 %v2956_v22, %v3629_v31  ;;  %2965 = vrcp.f32 %v1264_v35  ;;  %v2885_v35 = vld [vmem:[%s3318_s22] sm:$0xff]  }
 0x61d   : > { %v2958_v29 = vpop.eup %2957  ;;  %2743 = vmatprep.subr.bf16.mxu0 %v2885_v35 }
 0x61e   : > { %1896 = vrot.lane.b32.xlu0 %v1816_v24, %s3087_s23  ;;  %v1815_v19 = vmul.f32 %v2958_v29, %v3633_v41  ;;  %2744 = vmatpush3.bf16.msra.mxu0 %v2885_v35 }
 0x61f   : > { %p2594_p1 = scmp.ne.s32.totalorder %s3890_s0, 1 }
 0x620   : > { %v1817_v32 = vpack.c.bf16 %v1815_v19, %v1814_v23  ;;  %vm2305_vm8 = vcmask (!%p2594_p1), 253952   ;;  %s3891_s9 = sld [smem:[#allocation26_spill]] (!%p2594_p1) }
 0x621   : > { %v2960_v36 = vpop.eup %2959 }
 0x622   : > { %1898 = vrot.lane.b32.xlu1 %v1817_v32, %s3087_s23  ;;  %v2962_v39 = vpop.eup %2961  ;;  %v1273_v40 = vmul.f32 %v2960_v36, %v3641_v45  ;;  %s3892_s23 = sld [smem:[#allocation27_spill]] (!%p2594_p1) }
 0x623   : > { %v1272_v31 = vmul.f32 %v2962_v39, %v3637_v43 }
 0x625   : > { %v2964_v27 = vpop.eup %2963  ;;  %v1276_v44 = vpack.c.bf16 %v1273_v40, %v1272_v31 }
 0x626   : > { %v2966_v34 = vpop.eup %2965  ;;  %v1275_v30 = vmul.f32 %v2964_v27, %v3649_v42  ;;  %v2577_v42 = vld [vmem:[%s3885_s3] ss:$0 sm:$0xff] }
 0x627   : > { %v1274_v49 = vmul.f32 %v2966_v34, %v3645_v37 }
 0x629   : > { %v1277_v50 = vpack.c.bf16 %v1275_v30, %v1274_v49 }
 0x67c   : > { %v1887_v25 = vpop.permute.xlu1 %1886 }
 0x67d   : > { %v1905_v43 = vsel %vm1006_vm2, %v1277_v50, %v1887_v25  ;;  %v2886_v25 = vld [vmem:[%s3318_s22 + $0x8] sm:$0xff]  }
 0x67e   : > { %2745 = vmatprep.subr.bf16.mxu0 %v2886_v25 }
 0x67f   : > { %2746 = vmatpush3.bf16.msra.mxu0 %v2886_v25 }
 0x680   : > { %v1885_v41 = vpop.permute.xlu0 %1884 }
 0x681   : > { %v1902_v47 = vsel %vm1006_vm2, %v1276_v44, %v1885_v41 }
 0x687   : > { %v1893_v38 = vpop.permute.xlu1 %1892 }
 0x688   : > { %v1910_v54 = vsel %vm1906_vm7, %v1905_v43, %v1893_v38 }
 0x68b   : > { %v1891_v46 = vpop.permute.xlu1 %1890 }
 0x68c   : > { %v1908_v52 = vsel %vm1906_vm7, %v1902_v47, %v1891_v46 }
 0x690   : > { %v1897_v53 = vpop.permute.xlu0 %1896 }
 0x691   : > { %v1913_v45 = vsel %vm1911_vm6, %v1908_v52, %v1897_v53  ;;  %v2578_v52 = vld [vmem:[%s3886_s7] ss:$0 sm:$0xff] }
 0x692   : > { %2739 = vmatprep.mubr.bf16.mxu1 %v1913_v45 }
 0x694   : > { %v1899_v55 = vpop.permute.xlu1 %1898 }
 0x695   : > { %v1916_v56 = vsel %vm1911_vm6, %v1910_v54, %v1899_v55  ;;  %v2579_v55 = vld [vmem:[%s3887_s17] ss:$0 sm:$0xff] }
 0x696   : > { %2740 = vmatmul.mubr.bf16.vlgmr.msra.gmra.mrb[20].mxu1 %v1916_v56 }
 0x769   : > { %v2741_v37 = vpop.f32.mrb[20].mxu1 }
 0x76a   : > { %v1959_v58 = vpop.f32.mrb[21].mxu1  ;;  %v1968_v59 = vadd.f32 %v2741_v37, %v2577_v42 }
 0x76b   : > { %v1960_v60 = vadd.f32 %v2577_v42, %v1959_v58  ;;  %v2742_v61 = vpop.f32.mrb[22].mxu1 }
 0x76c   : > { %v1962_v0 = vpop.f32.mrb[23].mxu1  ;;  %v3682_v5 = vadd.f32 %v2984_v4, %v1968_v59  ;;  %v1971_v6 = vadd.f32 %v2742_v61, %v2577_v42 }
 0x76d   : > { %v3680_v2 = vadd.f32 %v2983_v1, %v1960_v60  ;;  %v1963_v63 = vadd.f32 %v2577_v42, %v1962_v0 }
 0x76e   : > { %v3690_v10 = vadd.f32 %v2986_v57, %v1971_v6  ;;  %v1986_v12 = vsel %vm1006_vm2, %v3682_v5, 0.0  ;;  %v2890_v57 = vld [vmem:[%s3332_s28 + $0x18] sm:$0xff]  }
 0x76f   : > { %v3684_v7 = vadd.f32 %v2985_v3, %v1963_v63  ;;  %v1980_v8 = vsel %vm1006_vm2, %v3680_v2, 0.0  ;;  %v2887_v3 = vld [vmem:[%s3332_s28] sm:$0xff]  }
 0x770   : > { %1981 = vadd.xlane.f32.xlu0 %v1980_v8  ;;  %v1989_v11 = vsel %vm1006_vm2, %v3690_v10, 0.0  ;;  %2751 = vmatprep.subr.bf16.mxu0 %v2887_v3  ;;  %v2888_v8 = vld [vmem:[%s3332_s28 + $0x8] sm:$0xff]  }
 0x771   : > { %v1983_v48 = vsel %vm1006_vm2, %v3684_v7, 0.0 }
 0x772   : > { %1984 = vadd.xlane.f32.xlu1 %v1983_v48  ;;  %v2889_v48 = vld [vmem:[%s3332_s28 + $0x10] sm:$0xff]  }
 0x774   : > { %1987 = vadd.xlane.f32.xlu0 %v1986_v12  ;;  %v2891_v12 = vld [vmem:[%s3332_s28 + $0x20] sm:$0xff]  }
 0x778   : > { %1990 = vadd.xlane.f32.xlu0 %v1989_v11  ;;  %v2892_v11 = vld [vmem:[%s3332_s28 + $0x28] sm:$0xff]  }
 0x7fd   : > { %v1982_v13 = vpop.xlane.xlu0 %1981 }
 0x7fe   : > { %v1992_v15 = vmul.f32 0.03125, %v1982_v13  ;;  %v2893_v13 = vld [vmem:[%s3332_s28 + $0x30] sm:$0xff]  }
 0x7ff   : > { %v1985_v51 = vpop.xlane.xlu1 %1984 }
 0x800   : > { %v1996_v16 = vsub.f32 %v3680_v2, %v1992_v15  ;;  %v1993_v62 = vmul.f32 0.03125, %v1985_v51  ;;  %v2894_v15 = vld [vmem:[%s3332_s28 + $0x38] sm:$0xff]   ;;  %v2580_v51 = vld [vmem:[%s3888_s21] ss:$0 sm:$0xff] }
 0x801   : > { %v1988_v18 = vpop.xlane.xlu0 %1987 }
 0x802   : > { %v1997_v17 = vsub.f32 %v3684_v7, %v1993_v62  ;;  %v1994_v20 = vmul.f32 0.03125, %v1988_v18  ;;  %v2000_v21 = vmul.f32 %v1996_v16, %v1996_v16 }
 0x804   : > { %v1998_v9 = vsub.f32 %v3682_v5, %v1994_v20  ;;  %v2004_v14 = vsel %vm1006_vm2, %v2000_v21, 0.0  ;;  %v2001_v22 = vmul.f32 %v1997_v17, %v1997_v17 }
 0x805   : > { %2005 = vadd.xlane.f32.xlu0 %v2004_v14  ;;  %v1991_v24 = vpop.xlane.xlu0 %1990 }
 0x806   : > { %v1995_v29 = vmul.f32 0.03125, %v1991_v24  ;;  %v2007_v23 = vsel %vm1006_vm2, %v2001_v22, 0.0  ;;  %v2002_v19 = vmul.f32 %v1998_v9, %v1998_v9 }
 0x807   : > { %2008 = vadd.xlane.f32.xlu1 %v2007_v23 }
 0x808   : > { %v1999_v32 = vsub.f32 %v3690_v10, %v1995_v29  ;;  %v2010_v26 = vsel %vm1006_vm2, %v2002_v19, 0.0 }
 0x809   : > { %2011 = vadd.xlane.f32.xlu0 %v2010_v26 }
 0x80a   : > { %v2003_v33 = vmul.f32 %v1999_v32, %v1999_v32 }
 0x80c   : > { %v2013_v28 = vsel %vm1006_vm2, %v2003_v33, 0.0 }
 0x80d   : > { %2014 = vadd.xlane.f32.xlu1 %v2013_v28 }
 0x892   : > { %v2006_v36 = vpop.xlane.xlu0 %2005 }
 0x893   : > { %v2016_v38 = vmul.f32 0.03125, %v2006_v36 }
 0x894   : > { %v2009_v39 = vpop.xlane.xlu1 %2008 }
 0x895   : > { %v2020_v40 = vadd.f32 1e-06, %v2016_v38  ;;  %v2017_v27 = vmul.f32 0.03125, %v2009_v39 }
 0x896   : > { %v2012_v31 = vpop.xlane.xlu0 %2011 }
 0x897   : > { %2967 = vrsqrt.f32 %v2020_v40  ;;  %v2021_v34 = vadd.f32 1e-06, %v2017_v27  ;;  %v2018_v41 = vmul.f32 0.03125, %v2012_v31 }
 0x899   : > { %2969 = vrsqrt.f32 %v2021_v34  ;;  %v2022_v30 = vadd.f32 1e-06, %v2018_v41 }
 0x89a   : > { %v2015_v44 = vpop.xlane.xlu1 %2014 }
 0x89b   : > { %2971 = vrsqrt.f32 %v2022_v30  ;;  %v2019_v46 = vmul.f32 0.03125, %v2015_v44 }
 0x89d   : > { %v2023_v49 = vadd.f32 1e-06, %v2019_v46 }
 0x89f   : > { %2973 = vrsqrt.f32 %v2023_v49 }
 0x8a1   : > { %v2968_v47 = vpop.eup %2967 }
 0x8a2   : > { %v2028_v53 = vmul.f32 %v2968_v47, %v1996_v16 }
 0x8a3   : > { %v2970_v50 = vpop.eup %2969 }
 0x8a4   : > { %v2029_v45 = vmul.f32 %v2970_v50, %v1997_v17  ;;  %v2038_v43 = vmul.f32 %v2578_v52, %v2028_v53 }
 0x8a5   : > { %v2972_v54 = vpop.eup %2971 }
 0x8a6   : > { %v2030_v56 = vmul.f32 %v2972_v54, %v1998_v9  ;;  %v2039_v42 = vmul.f32 %v2578_v52, %v2029_v45  ;;  %v2048_v37 = vadd.f32 %v2579_v55, %v2038_v43 }
 0x8a8   : > { %v2049_v58 = vadd.f32 %v2579_v55, %v2039_v42  ;;  %v2040_v60 = vmul.f32 %v2578_v52, %v2030_v56 }
 0x8a9   : > { %v2974_v59 = vpop.eup %2973 }
 0x8aa   : > { %v2031_v61 = vmul.f32 %v2974_v59, %v1999_v32  ;;  %v2052_v0 = vpack.c.bf16 %v2049_v58, %v2048_v37  ;;  %v2050_v63 = vadd.f32 %v2579_v55, %v2040_v60 }
 0x8ac   : > { %v2041_v1 = vmul.f32 %v2578_v52, %v2031_v61  ;;  %2747 = vmatprep.mubr.msk.bf16.mxu0 %vm1006_vm2, %v2052_v0  ;;  %v2585_v0 = vld [vmem:[%s3889_s29] ss:$0 sm:$0xff] }
 0x8ae   : > { %v2051_v4 = vadd.f32 %v2579_v55, %v2041_v1 }
 0x8b0   : > { %v2053_v6 = vpack.c.bf16 %v2051_v4, %v2050_v63 }
 0x8b2   : > { %2748 = vmatmul.mubr.msk.bf16.vlgmr.msra.gmra.mrb[16].mxu0 %vm1006_vm2, %v2053_v6 }
 0x8b3   : > { %2752 = vmatpush3.bf16.msra.mxu0 %v2887_v3 }
 0x8b4   : > { %2753 = vmatprep.subr.bf16.mxu0 %v2888_v8 }
 0x8b7   : > { %2754 = vmatpush3.bf16.msra.mxu0 %v2888_v8 }
 0x8b8   : > { %2755 = vmatprep.subr.bf16.mxu0 %v2889_v48 }
 0x8bb   : > { %2756 = vmatpush3.bf16.msra.mxu0 %v2889_v48 }
 0x8bc   : > { %2757 = vmatprep.subr.bf16.mxu0 %v2890_v57 }
 0x8bf   : > { %2758 = vmatpush3.bf16.msra.mxu0 %v2890_v57 }
 0x8c0   : > { %2759 = vmatprep.subr.bf16.mxu0 %v2891_v12 }
 0x8c3   : > { %2760 = vmatpush3.bf16.msra.mxu0 %v2891_v12 }
 0x8c4   : > { %2761 = vmatprep.subr.bf16.mxu0 %v2892_v11 }
 0x8c7   : > { %2762 = vmatpush3.bf16.msra.mxu0 %v2892_v11 }
 0x8c8   : > { %2763 = vmatprep.subr.bf16.mxu0 %v2893_v13 }
 0x8cb   : > { %2764 = vmatpush3.bf16.msra.mxu0 %v2893_v13 }
 0x8cc   : > { %2765 = vmatprep.subr.bf16.mxu0 %v2894_v15 }
 0x8cf   : > { %2766 = vmatpush3.bf16.msra.mxu0 %v2894_v15 }
 0x985   : > { %v2749_v16 = vpop.f32.mrb[16].mxu0 }
 0x986   : > { %v2126_v62 = vadd.f32 %v2749_v16, %v2580_v51  ;;  %v2117_v18 = vpop.f32.mrb[17].mxu0 }
 0x987   : > { %v2118_v17 = vadd.f32 %v2580_v51, %v2117_v18  ;;  %v2750_v20 = vpop.f32.mrb[18].mxu0 }
 0x988   : > { %v2134_v21 = vmul.f32 %v2126_v62, %v2126_v62  ;;  %v2129_v9 = vadd.f32 %v2750_v20, %v2580_v51  ;;  %v2120_v14 = vpop.f32.mrb[19].mxu0 }
 0x989   : > { %v2132_v22 = vmul.f32 %v2118_v17, %v2118_v17  ;;  %v2121_v24 = vadd.f32 %v2580_v51, %v2120_v14 }
 0x98a   : > { %v2138_v29 = vmul.f32 %v2134_v21, %v2126_v62  ;;  %v2135_v23 = vmul.f32 %v2129_v9, %v2129_v9 }
 0x98b   : > { %v2136_v19 = vmul.f32 %v2132_v22, %v2118_v17  ;;  %v2133_v32 = vmul.f32 %v2121_v24, %v2121_v24  ;;  %v2304_v22 = vld [vmem:[%s3892_s23] sm:$0x1] (!%p2594_p1) }
 0x98c   : > { %v2142_v26 = vmul.f32 0.044715, %v2138_v29  ;;  %v2139_v33 = vmul.f32 %v2135_v23, %v2129_v9 }
 0x98d   : > { %v2140_v28 = vmul.f32 0.044715, %v2136_v19  ;;  %v2137_v35 = vmul.f32 %v2133_v32, %v2121_v24 }
 0x98e   : > { %v2146_v25 = vadd.f32 %v2142_v26, %v2126_v62  ;;  %v2143_v36 = vmul.f32 0.044715, %v2139_v33 }
 0x98f   : > { %v2144_v38 = vadd.f32 %v2140_v28, %v2118_v17  ;;  %v2141_v39 = vmul.f32 0.044715, %v2137_v35 }
 0x990   : > { %v2150_v40 = vmul.f32 0.7978846, %v2146_v25  ;;  %v2147_v27 = vadd.f32 %v2143_v36, %v2129_v9 }
 0x991   : > { %v2148_v31 = vmul.f32 0.7978846, %v2144_v38  ;;  %v2145_v34 = vadd.f32 %v2141_v39, %v2121_v24 }
 0x992   : > { %2975 = vtanh.f32 %v2150_v40  ;;  %v2151_v41 = vmul.f32 0.7978846, %v2147_v27 }
 0x993   : > { %2977 = vtanh.f32 %v2148_v31  ;;  %v2149_v30 = vmul.f32 0.7978846, %v2145_v34 }
 0x994   : > { %2979 = vtanh.f32 %v2151_v41 }
 0x995   : > { %2981 = vtanh.f32 %v2149_v30 }
 0x99c   : > { %v2976_v44 = vpop.eup %2975 }
 0x99d   : > { %v2978_v46 = vpop.eup %2977  ;;  %v2158_v49 = vadd.f32 1.0, %v2976_v44 }
 0x99e   : > { %v2980_v47 = vpop.eup %2979  ;;  %v2156_v52 = vadd.f32 1.0, %v2978_v46 }
 0x99f   : > { %v2982_v53 = vpop.eup %2981  ;;  %v2162_v50 = vmul.f32 0.5, %v2158_v49  ;;  %v2159_v45 = vadd.f32 1.0, %v2980_v47 }
 0x9a0   : > { %v2157_v43 = vadd.f32 1.0, %v2982_v53  ;;  %v2160_v54 = vmul.f32 0.5, %v2156_v52 }
 0x9a1   : > { %v2163_v55 = vmul.f32 0.5, %v2159_v45  ;;  %v2166_v42 = vmul.f32 %v2162_v50, %v2126_v62 }
 0x9a2   : > { %v2161_v56 = vmul.f32 0.5, %v2157_v43  ;;  %v2164_v58 = vmul.f32 %v2160_v54, %v2118_v17 }
 0x9a3   : > { %v2167_v37 = vmul.f32 %v2163_v55, %v2129_v9  ;;  %v2303_v9 = vld [vmem:[%s3891_s9] sm:$0x1] (!%p2594_p1) }
 0x9a4   : > { %v2165_v59 = vmul.f32 %v2161_v56, %v2121_v24 }
 0x9a5   : > { %v2169_v60 = vpack.c.bf16 %v2167_v37, %v2166_v42 }
 0x9a6   : > { %v2168_v61 = vpack.c.bf16 %v2165_v59, %v2164_v58 }
 0x9a8   : > { %2767 = vmatprep.mubr.bf16.mxu0 %v2168_v61 }
 0x9a9   : > { %2768 = vmatmul.mubr.bf16.vlgmr.msra.gmra.mrb[20].mxu0 %v2169_v60 }
 0xa7c   : > { %v2769_v1 = vpop.f32.mrb[20].mxu0 }
 0xa7d   : > { %v2284_v63 = vadd.f32 %v2769_v1, %v2585_v0  ;;  %v2275_v4 = vpop.f32.mrb[21].mxu0 }
 0xa7e   : > { %v2276_v6 = vadd.f32 %v2585_v0, %v2275_v4  ;;  %v2770_v3 = vpop.f32.mrb[22].mxu0  ;;  %2301 = sbr.rel (%p2594_p1) target bundleno = 3011 (0xbc3), region = 104 }
 0xa7f   : > { %v2292_v8 = vadd.f32 %v2284_v63, %v3682_v5  ;;  %v2287_v48 = vadd.f32 %v2770_v3, %v2585_v0  ;;  %v2278_v57 = vpop.f32.mrb[23].mxu0 }
 0xa80   : > { %v2290_v12 = vadd.f32 %v2276_v6, %v3680_v2  ;;  %v2279_v11 = vadd.f32 %v2585_v0, %v2278_v57 }
 0xa81   : > { %2296 = vst.msk [vmem:[#allocation2 + $0x10] sm:$0xff] %vm1006_vm2, %v2292_v8  ;;  %v2293_v13 = vadd.f32 %v2287_v48, %v3690_v10 }
 0xa82   : > { %2294 = vst.msk [vmem:[#allocation2] sm:$0xff] %vm1006_vm2, %v2290_v12  ;;  %v2291_v15 = vadd.f32 %v2279_v11, %v3684_v7 }
 0xa83   : > { %2297 = vst.msk [vmem:[#allocation2 + $0x18] sm:$0xff] %vm1006_vm2, %v2293_v13 }
 0xa84   : > { %2295 = vst.msk [vmem:[#allocation2 + $0x8] sm:$0xff] %vm1006_vm2, %v2291_v15 }
 0xa88   : > { %v2302_v5 = vld [vmem:[#allocation2 + $0x10] sm:$0x1] }
 0xa89   : > { %v2306_v2 = vsel %vm2305_vm8, %v2302_v5, 0.0 }
 0xa8a   : > { %2307 = vadd.xlane.f32.xlu0 %v2306_v2 }
 0xb17   : > { %v2308_v51 = vpop.xlane.xlu0 %2307 }
 0xb18   : > { %v2309_v16 = vmul.f32 0.03125, %v2308_v51 }
 0xb1a   : > { %v2310_v10 = vsub.f32 %v2302_v5, %v2309_v16 }
 0xb1c   : > { %v2311_v62 = vmul.f32 %v2310_v10, %v2310_v10 }
 0xb1e   : > { %v2312_v18 = vsel %vm2305_vm8, %v2311_v62, 0.0 }
 0xb1f   : > { %2313 = vadd.xlane.f32.xlu0 %v2312_v18 }
 0xbac   : > { %v2314_v7 = vpop.xlane.xlu0 %2313 }
 0xbad   : > { %v2315_v17 = vmul.f32 0.03125, %v2314_v7 }
 0xbaf   : > { %v2316_v20 = vadd.f32 1e-06, %v2315_v17 }
 0xbb1   : > { %2987 = vrsqrt.f32 %v2316_v20 }
 0xbbb   : > { %v2988_v21 = vpop.eup %2987 }
 0xbbc   : > { %v2318_v14 = vmul.f32 %v2988_v21, %v2310_v10 }
 0xbbe   : > { %v2319_v24 = vmul.f32 %v2318_v14, %v2303_v9 }
 0xbc0   : > { %v2320_v29 = vadd.f32 %v2319_v24, %v2304_v22 }
 0xbc2   : > { %2321 = vst.msk [vmem:[%s3336_s18] sm:$0x1] %vm2305_vm8, %v2320_v29 }
 0xbc3 PF: > { %s3893_s7 = sld [smem:[#allocation9_spill]]  ;;  %s3895_s1 = sld [smem:[#allocation28_spill]] }
 0xbc4   : > { %s2335_s2 = sshll.u32 %s3336_s18, 4  ;;  %s3897_s29 = sand.u32 1, %s3059_s30   ;;  %s2336_s2 = int_to_ptr.vmem [resolvable:$true] %s2335_s2 }
 0xbc5   : > { %s2323_s0 = scalar_lea.sflag [#allocation4], %s3897_s29  ;;  %s2989_s24 = scalar_lea.vmem %s2336_s2, 16 }
 0xbc6   : > { %p2990_p2 = scmp.ne.s32.totalorder %s2336_s2, %s2989_s24  ;;  %s3099_s20 = smov [#allocation3]  }
 0xbc7   : > { %s2993_s9 = sshll.u32 %s3099_s20, 4  ;;  %s2994_s9 = int_to_ptr.vmem [resolvable:$false] %s2993_s9 }
 0xbc8   : > { %p2991_p4 = pnand %p2990_p2, %p3249_p3  ;;  %s2995_s3 = scalar_lea.vmem %s2994_s9, 32 }
 0xbc9   : > { %s2595_s26 = sshll.u32 %s3893_s7, 4  ;;  %s3896_s28 = smov %s3895_s1 }
 0xbca   : > { %s3759_s21 = scalar_lea.hbm %s3895_s1, %s2595_s26  ;;  %p2992_p5 = pneg %p2991_p4 }
 0xbcb   : > { %p2996_p6 = scmp.lt.s32.totalorder %s2336_s2, %s2994_s9  ;;  %p2997_p7 = scmp.lt.s32.totalorder %s2995_s3, %s2989_s24 }
 0xbcd   : > { %p2998_p8 = por %p2997_p7, %p2996_p6 }
 0xbcf   : > { %p2999_p10 = pnand %p2998_p8, %p2992_p5 }
 0xbd1   : > { %3002 = shalt.err (!%p2999_p10)
}
 0xbd2   : > { %s3003_s18 = scalar_lea.hbm %s3759_s21, 16  ;;  %s3007_s7 = scalar_lea.hbm %s3896_s28, 32 }
 0xbd3   : > { %p3004_p11 = scmp.ne.s32.totalorder %s3759_s21, %s3003_s18  ;;  %p3008_p0 = scmp.lt.u32.totalorder %s3759_s21, %s3896_s28 }
 0xbd4   : > { %p3009_p1 = scmp.lt.u32.totalorder %s3007_s7, %s3003_s18  ;;  %p3011_p4 = scmp.lt.u32.totalorder %s3003_s18, %s3759_s21 }
 0xbd5   : > { %p3005_p12 = pnand %p3004_p11, %p3249_p3 }
 0xbd6   : > { %p3010_p2 = por %p3009_p1, %p3008_p0 }
 0xbd7   : > { %p3006_p13 = pneg %p3005_p12 }
 0xbd8   : > { %p3012_p5 = por %p3011_p4, %p3010_p2 }
 0xbda   : > { %p3013_p6 = pnand %p3012_p5, %p3006_p13 }
 0xbdc   : > { %3016 = shalt.err (!%p3013_p6)
}
 0xbdd   : > { %2783 = dma.vmem_to_hbm [thread:$0]  (%p3249_p3), %s2336_s2, 16, %s3759_s21, %s2323_s0  }
 0xbde PF: > { %s3898_s6 = sld [smem:[#allocation12_spill]]  ;;  %s3899_s1 = sld [smem:[#allocation6_spill]] }
 0xbe4   : > { %p2789_p7 = scmp.ge.s32.totalorder %s3898_s6, 2  ;;  %s2347_s24 = sand.u32 1, %s3899_s1  }
 0xbe5   : > { %s2348_s20 = scalar_lea.sflag [#allocation4], %s2347_s24 }
 0xbe6   : > { %p2786_p8 = pnand %p2789_p7, %p3259_p9 }
 0xbe8   : > { %3050 = dma.done.wait (!%p2786_p8), %s2348_s20, 16  }
 0xbe9   : > { %3052 = vsyncadd (!%p2786_p8), %s2348_s20, 4294967280  ;;  %s32_s23 = sadd.s32 1, %s3898_s6   ;;  %s3901_s9 = sld [smem:[#allocation7_spill]] }
 0xbea   : > { %p29_p10 = scmp.ge.s32.totalorder %s32_s23, 6   ;;  %s3902_s20 = sld [smem:[#allocation17_spill]] }
 0xbeb   : > { %s3903_s21 = sld [smem:[#allocation10_spill]]  ;;  %s3904_s1 = sld [smem:[#allocation11_spill]] }
 0xbec   : > { %s3905_s22 = sld [smem:[#allocation13_spill]]  ;;  %s3906_s2 = sld [smem:[#allocation15_spill]] }
 0xbed   : > { %s3907_s0 = smov %s3059_s30  ;;  %31 = sbr.rel (!%p29_p10) target bundleno = 17 (0x11), region = 175 }
 0xbef   : > { %s3908_s30 = smov %s3901_s9 }
 0xbf4   :  { %2352 = vsyncpa [#allocation4], 1 }
 0xbf5   :  { %2354 = vsyncpa [#allocation4 + $0x1], 1 }

</bundles_post_ra>
